<compile_context>
chip_gen: v7x
topology: tpu7x:2x2x1
jax: 0.10.0
libtpu: 0.0.40
codegen_flags: <defaults>
</compile_context>

<pallas_src>
import jax
import jax.numpy as jnp
from jax import lax
from jax.experimental import pallas as pl
from jax.experimental.pallas import tpu as pltpu


_MAX_TRIPLES_PER_CALL = 32768   # keeps 3 int32 SMEM-prefetch arrays <= ~384 KiB


def _vmem_capacity_bytes():
    try:
        return int(pltpu.get_tpu_info().vmem_capacity_bytes)
    except Exception:
        return 64 * 2**20   # v7x per-TensorCore VMEM; conservative everywhere


def _choose_block_b(batch, emb, itemsize, n_bufs, reserved_bytes, max_block):
    """Largest gather block that fits the double-buffered scratch in VMEM."""
    cap = _vmem_capacity_bytes()
    budget = max(4 << 20, int(cap * 0.6) - reserved_bytes)
    # per-row cost: gather scratch (n_bufs buffers) + f32 compute temporaries.
    per_row = n_bufs * emb * itemsize + 4 * emb * 4
    fit = budget // max(1, per_row)
    align = 16 if itemsize < 4 else 8        # bf16 sublane packing
    blk = int(min(max_block, max(align, fit)))
    blk -= blk % align
    blk = max(align, blk)
    b_aligned = -(-batch // align) * align   # no point tiling past the batch
    return max(align, min(blk, b_aligned))


# --------------------------------------------------------------------------- #
# Triple-scoring kernel (fused gather, double-buffered)
# --------------------------------------------------------------------------- #

def _distmult_body(s_idx_ref, p_idx_ref, o_idx_ref, ent_ref, rel_ref, pvec_ref,
                   out_ref, s_buf, p_buf, o_buf, sem, *, rel_resident):
    block_b = s_buf.shape[1]
    i = pl.program_id(1)                 # inner (pipelined) axis, sequential per core
    ipb = pl.num_programs(1)
    g = pl.program_id(0) * ipb + i       # global block index
    slot = i % 2
    nxt = 1 - slot

    def issue_gather(block_idx, buf_slot):
        base = block_idx * block_b

        def issue_row(rr, carry):
            # All scalar (SMEM) index reads happen before the waits below.
            pltpu.make_async_copy(
                ent_ref.at[pl.ds(s_idx_ref[base + rr], 1), :],
                s_buf.at[buf_slot, pl.ds(rr, 1), :],
                sem.at[buf_slot, 0]).start()
            pltpu.make_async_copy(
                ent_ref.at[pl.ds(o_idx_ref[base + rr], 1), :],
                o_buf.at[buf_slot, pl.ds(rr, 1), :],
                sem.at[buf_slot, 1]).start()
            if not rel_resident:
                pltpu.make_async_copy(
                    rel_ref.at[pl.ds(p_idx_ref[base + rr], 1), :],
                    p_buf.at[buf_slot, pl.ds(rr, 1), :],
                    sem.at[buf_slot, 2]).start()
            return carry

        # Partial unroll keeps the (bottleneck) DMA-descriptor issue slots busy.
        lax.fori_loop(0, block_b, issue_row, 0, unroll=8)

    # Prime the pipeline on this core's first inner step.
    @pl.when(i == 0)
    def _():
        issue_gather(g, slot)

    # Prefetch the next block into the other slot while this block's copies are
    # still in flight / while we compute below (double-buffering).
    @pl.when(i + 1 < ipb)
    def _():
        issue_gather(g + 1, nxt)

    # One wait per table per slot: the DMA semaphore accumulated the bytes of
    # every row copy issued on it; a descriptor spanning the whole slot buffer
    # waits for (and consumes) exactly that total.
    pltpu.make_async_copy(s_buf.at[slot], s_buf.at[slot], sem.at[slot, 0]).wait()
    pltpu.make_async_copy(o_buf.at[slot], o_buf.at[slot], sem.at[slot, 1]).wait()
    if not rel_resident:
        pltpu.make_async_copy(p_buf.at[slot], p_buf.at[slot], sem.at[slot, 2]).wait()

    s = s_buf[slot].astype(jnp.float32)
    o = o_buf[slot].astype(jnp.float32)

    if rel_resident:
        # Relation table is resident in VMEM; gather its rows with a one-hot
        # MXU matmul (the MXU is otherwise idle) instead of per-row DMAs.
        rel = rel_ref[...].astype(jnp.float32)                      # (r, emb)
        n_rel = rel.shape[0]
        one_hot_t = (lax.broadcasted_iota(jnp.int32, (n_rel, block_b), 0)
                     == pvec_ref[0]).astype(jnp.float32)            # (r, block_b)
        p_rows = lax.dot_general(one_hot_t, rel, (((0,), (0,)), ((), ())),
                                 preferred_element_type=jnp.float32)  # (block_b, emb)
    else:
        p_rows = p_buf[slot].astype(jnp.float32)

    # VPU product + XLU lane reduction, f32 accumulation.
    out_ref[...] = jnp.sum(s * o * p_rows, axis=-1, keepdims=True)


def _make_distmult_kernel(rel_resident):
    if rel_resident:
        def kernel(s_idx_ref, p_idx_ref, o_idx_ref, ent_ref, rel_ref, pvec_ref,
                   out_ref, s_buf, o_buf, sem):
            _distmult_body(s_idx_ref, p_idx_ref, o_idx_ref, ent_ref, rel_ref,
                           pvec_ref, out_ref, s_buf, None, o_buf, sem,
                           rel_resident=True)
    else:
        def kernel(s_idx_ref, p_idx_ref, o_idx_ref, ent_ref, rel_ref,
                   out_ref, s_buf, p_buf, o_buf, sem):
            _distmult_body(s_idx_ref, p_idx_ref, o_idx_ref, ent_ref, rel_ref,
                           None, out_ref, s_buf, p_buf, o_buf, sem,
                           rel_resident=False)
    return kernel


def _distmult_score_chunk(entities, relations, s_idx, p_idx, o_idx, *,
                          max_block, rel_vmem_budget):
    _, emb = entities.shape
    n_rel, emb_r = relations.shape
    assert emb_r == emb
    (batch,) = s_idx.shape
    ent_size = jnp.dtype(entities.dtype).itemsize
    rel_size = jnp.dtype(relations.dtype).itemsize
    itemsize = max(ent_size, rel_size)
    cap = _vmem_capacity_bytes()

    if rel_vmem_budget is None:
        rel_vmem_budget = min(16 << 20, cap // 8)    # 8 MiB on v7x, 16 MiB v5e/v6e
    rel_bytes = n_rel * emb * rel_size
    rel_resident = (rel_bytes <= rel_vmem_budget) and (n_rel <= 2048)

    n_bufs = 4 if rel_resident else 6                # double-buffered (s,o) [+ p]
    reserved = 2 * rel_bytes if rel_resident else 0  # Pallas double-buffers inputs
    block_b = _choose_block_b(batch, emb, itemsize, n_bufs, reserved, max_block)

    num_blocks = -(-batch // block_b)
    outer = 2 if num_blocks >= 2 else 1              # core-shardable parallel axis
    ipb = -(-num_blocks // outer)
    g_total = outer * ipb
    b_pad = g_total * block_b
    pad = b_pad - batch

    s_idx = s_idx.astype(jnp.int32)
    p_idx = p_idx.astype(jnp.int32)
    o_idx = o_idx.astype(jnp.int32)
    if pad:
        # Pad with index 0 (valid row); padded scores are sliced off below.
        s_idx = jnp.pad(s_idx, (0, pad))
        p_idx = jnp.pad(p_idx, (0, pad))
        o_idx = jnp.pad(o_idx, (0, pad))

    scratch_bytes = n_bufs * block_b * emb * itemsize
    f32_temps = 4 * block_b * emb * 4
    need = scratch_bytes + f32_temps + reserved + 8 * block_b * 4 + (4 << 20)
    vmem_limit = int(min(cap - (4 << 20), max(32 << 20, need)))

    kernel = _make_distmult_kernel(rel_resident)

    if rel_resident:
        p_blocks = p_idx.reshape(g_total, 1, block_b)
        in_specs = [
            pl.BlockSpec(memory_space=pl.ANY),                          # E in HBM
            pl.BlockSpec((n_rel, emb), lambda co, i, *_: (0, 0)),       # R resident
            pl.BlockSpec((1, 1, block_b),
                         lambda co, i, *_: (co * ipb + i, 0, 0)),       # p indices
        ]
        operands = (s_idx, p_idx, o_idx, entities, relations, p_blocks)
        scratch = [
            pltpu.VMEM((2, block_b, emb), entities.dtype),
            pltpu.VMEM((2, block_b, emb), entities.dtype),
            pltpu.SemaphoreType.DMA((2, 2)),
        ]
    else:
        in_specs = [
            pl.BlockSpec(memory_space=pl.ANY),                          # E in HBM
            pl.BlockSpec(memory_space=pl.ANY),                          # R in HBM
        ]
        operands = (s_idx, p_idx, o_idx, entities, relations)
        scratch = [
            pltpu.VMEM((2, block_b, emb), entities.dtype),
            pltpu.VMEM((2, block_b, emb), relations.dtype),
            pltpu.VMEM((2, block_b, emb), entities.dtype),
            pltpu.SemaphoreType.DMA((2, 3)),
        ]

    out = pl.pallas_call(
        kernel,
        out_shape=jax.ShapeDtypeStruct((b_pad, 1), jnp.float32),
        grid_spec=pltpu.PrefetchScalarGridSpec(
            num_scalar_prefetch=3,                    # s_idx, p_idx, o_idx -> SMEM
            grid=(outer, ipb),
            in_specs=in_specs,
            out_specs=pl.BlockSpec((block_b, 1),
                                   lambda co, i, *_: (co * ipb + i, 0)),
            scratch_shapes=scratch,
        ),
        compiler_params=pltpu.CompilerParams(
            # Outer axis is safe to shard across TensorCores because the
            # software pipeline re-primes at inner==0 for every outer value.
            dimension_semantics=("parallel", "arbitrary"),
            vmem_limit_bytes=vmem_limit,
        ),
    )(*operands)
    return out[:batch, 0]


def distmult_score(entities, relations, s_idx, p_idx, o_idx, *,
                   max_block=1024, rel_vmem_budget=None):
    """Raw DistMult scores for flat index triples.  Returns float32 [B]."""
    (batch,) = s_idx.shape
    if batch == 0:
        return jnp.zeros((0,), jnp.float32)
    if batch <= _MAX_TRIPLES_PER_CALL:
        return _distmult_score_chunk(entities, relations, s_idx, p_idx, o_idx,
                                     max_block=max_block,
                                     rel_vmem_budget=rel_vmem_budget)
    # Chunk so the SMEM-prefetched index arrays always fit.
    outs = []
    for start in range(0, batch, _MAX_TRIPLES_PER_CALL):
        stop = min(start + _MAX_TRIPLES_PER_CALL, batch)
        outs.append(_distmult_score_chunk(
            entities, relations, s_idx[start:stop], p_idx[start:stop],
            o_idx[start:stop], max_block=max_block,
            rel_vmem_budget=rel_vmem_budget))
    return jnp.concatenate(outs, axis=0)


# --------------------------------------------------------------------------- #
# 1-vs-all ranking path:  (E[s] * R[p]) @ E^T  on the MXU
# --------------------------------------------------------------------------- #

def _score_all_kernel(q_ref, e_ref, out_ref):
    out_ref[...] = lax.dot_general(
        q_ref[...].astype(jnp.float32), e_ref[...].astype(jnp.float32),
        (((1,), (1,)), ((), ())), preferred_element_type=jnp.float32)


def distmult_score_all(entities, relations, s_idx, p_idx, *, tb=128, tn=512):
    """Scores every entity as the object of each (s, p).  Returns f32 [B, n]."""
    n, emb = entities.shape
    cap = _vmem_capacity_bytes()
    q = (jnp.take(entities, s_idx, axis=0).astype(jnp.float32)
         * jnp.take(relations, p_idx, axis=0).astype(jnp.float32))
    B = q.shape[0]

    tb = int(min(tb, -(-B // 8) * 8))
    tb = max(8, tb - tb % 8)
    tn = int(min(tn, -(-n // 128) * 128))
    while tn > 128 and 2 * (tb + tn) * emb * 4 > cap // 2:
        tn //= 2                                  # tn stays a multiple of 128
    b_pad = -(-B // tb) * tb
    n_pad = -(-n // tn) * tn

    q = jnp.pad(q, ((0, b_pad - B), (0, 0)))
    e = jnp.pad(entities, ((0, n_pad - n), (0, 0)))

    need = 2 * (tb * emb * 4 + tn * emb * 4 + tb * tn * 4) + (4 << 20)
    vmem_limit = int(min(cap - (4 << 20), max(32 << 20, need)))

    out = pl.pallas_call(
        _score_all_kernel,
        out_shape=jax.ShapeDtypeStruct((b_pad, n_pad), jnp.float32),
        grid_spec=pltpu.PrefetchScalarGridSpec(
            num_scalar_prefetch=0,
            grid=(b_pad // tb, n_pad // tn),
            in_specs=[pl.BlockSpec((tb, emb), lambda i, j: (i, 0)),
                      pl.BlockSpec((tn, emb), lambda i, j: (j, 0))],
            out_specs=pl.BlockSpec((tb, tn), lambda i, j: (i, j)),
        ),
        compiler_params=pltpu.CompilerParams(
            dimension_semantics=("parallel", "parallel"),
            vmem_limit_bytes=vmem_limit,
        ),
    )(q, e)
    return out[:B, :n]


# --------------------------------------------------------------------------- #
# Module wrapper
# --------------------------------------------------------------------------- #

class KGEModelPallas:
    """JAX/Pallas KGEModel (decoder='distmult', biases=False, reciprocal=False)."""

    def __init__(self, n, r, embedding=512, decoder='distmult', init=0.85,
                 biases=False, init_method='uniform', reciprocal=False,
                 table_dtype=jnp.float32, key=None):
        assert decoder == 'distmult'
        assert not biases and not reciprocal   # default KGEModel configuration
        # TODO(synk): 'transe'/'complex' decoders, biases, reciprocal mode and
        # embedding dropout are not in the default forward path; not implemented.
        if key is None:
            key = jax.random.PRNGKey(0)
        if init_method != 'uniform':
            raise NotImplementedError(init_method)
        self.n, self.r, self.e = n, r, embedding
        k_e, k_r = jax.random.split(key)
        # nn.Embedding-like tables init'd U(-init, init).
        self.entities = jax.random.uniform(
            k_e, (n, embedding), jnp.float32, minval=-init, maxval=init
        ).astype(table_dtype)
        self.relations = jax.random.uniform(
            k_r, (r, embedding), jnp.float32, minval=-init, maxval=init
        ).astype(table_dtype)

    def __call__(self, s, p, o):
        # Broadcast index tensors together (as the PyTorch forward documents).
        # TODO(synk): auto-detect 1-vs-all broadcast patterns and route them to
        # score_all_objects (MXU matmul) instead of per-pair row gathers.
        s, p, o = jnp.broadcast_arrays(jnp.asarray(s), jnp.asarray(p), jnp.asarray(o))
        out_shape = s.shape
        scores = distmult_score(self.entities, self.relations,
                                s.reshape(-1), p.reshape(-1), o.reshape(-1))
        return scores.reshape(out_shape)

    def score_all_objects(self, s, p):
        """Scores of (s, p, *) against every entity — MXU matmul ranking path."""
        s, p = jnp.broadcast_arrays(jnp.asarray(s), jnp.asarray(p))
        shape = s.shape
        scores = distmult_score_all(self.entities, self.relations,
                                    s.reshape(-1).astype(jnp.int32),
                                    p.reshape(-1).astype(jnp.int32))
        return scores.reshape(shape + (self.n,))


if __name__ == "__main__":
    key = jax.random.PRNGKey(0)
    k_model, k_s, k_p, k_o = jax.random.split(key, 4)

    n_entities, n_relations, emb_dim = 10, 5, 128
    batch = 8

    model = KGEModelPallas(n_entities, n_relations, embedding=emb_dim, key=k_model)

    s_idx = jax.random.randint(k_s, (batch,), 0, n_entities, dtype=jnp.int32)
    p_idx = jax.random.randint(k_p, (batch,), 0, n_relations, dtype=jnp.int32)
    o_idx = jax.random.randint(k_o, (batch,), 0, n_entities, dtype=jnp.int32)

    ent_f32 = model.entities.astype(jnp.float32)
    rel_f32 = model.relations.astype(jnp.float32)

    # 1) Default path: relation table resident in VMEM, one-hot MXU gather.
    scores = jax.block_until_ready(model(s_idx, p_idx, o_idx))
    ref = jnp.sum(ent_f32[s_idx] * rel_f32[p_idx] * ent_f32[o_idx], axis=-1)
    assert scores.shape == (batch,)
    assert jnp.allclose(scores, ref, atol=1e-5, rtol=1e-5)

    # 2) Fallback path: relation rows DMA-gathered from HBM (forced).
    scores_hbm = jax.block_until_ready(
        distmult_score(model.entities, model.relations, s_idx, p_idx, o_idx,
                       rel_vmem_budget=0))
    assert jnp.allclose(scores_hbm, ref, atol=1e-5, rtol=1e-5)

    # 3) Broadcasting path (exercises padding inside the wrapper).
    s2 = s_idx[:4].reshape(4, 1)
    p2 = p_idx[:1].reshape(1, 1)
    o2 = o_idx[:3].reshape(1, 3)
    scores2 = jax.block_until_ready(model(s2, p2, o2))
    sb, pb, ob = jnp.broadcast_arrays(s2, p2, o2)
    ref2 = jnp.sum(ent_f32[sb] * rel_f32[pb] * ent_f32[ob], axis=-1)
    assert scores2.shape == (4, 3)
    assert jnp.allclose(scores2, ref2, atol=1e-5, rtol=1e-5)

    # 4) Multi-block, double-buffered pipeline (forced small blocks), both paths.
    ks2, kp2, ko2 = jax.random.split(jax.random.PRNGKey(1), 3)
    nb = 300
    s_l = jax.random.randint(ks2, (nb,), 0, n_entities, dtype=jnp.int32)
    p_l = jax.random.randint(kp2, (nb,), 0, n_relations, dtype=jnp.int32)
    o_l = jax.random.randint(ko2, (nb,), 0, n_entities, dtype=jnp.int32)
    ref_l = jnp.sum(ent_f32[s_l] * rel_f32[p_l] * ent_f32[o_l], axis=-1)
    scores_l = jax.block_until_ready(
        distmult_score(model.entities, model.relations, s_l, p_l, o_l,
                       max_block=64))
    assert jnp.allclose(scores_l, ref_l, atol=1e-5, rtol=1e-5)
    scores_l_hbm = jax.block_until_ready(
        distmult_score(model.entities, model.relations, s_l, p_l, o_l,
                       max_block=64, rel_vmem_budget=0))
    assert jnp.allclose(scores_l_hbm, ref_l, atol=1e-5, rtol=1e-5)

    # 5) 1-vs-all ranking path on the MXU.
    scores_all = jax.block_until_ready(model.score_all_objects(s_idx[:4], p_idx[:4]))
    ref_all = (ent_f32[s_idx[:4]] * rel_f32[p_idx[:4]]) @ ent_f32.T
    assert scores_all.shape == (4, n_entities)
    assert jnp.allclose(scores_all, ref_all, atol=1e-4, rtol=1e-4)

    print("KERNEL_OK")
</pallas_src>

<mosaic_0001>
module attributes {stable_mosaic.version = 11 : i64} {
  func.func @kernel(%arg0: i32, %arg1: i32, %arg2: memref<8xi32, #tpu.memory_space<smem>>, %arg3: memref<8xi32, #tpu.memory_space<smem>>, %arg4: memref<8xi32, #tpu.memory_space<smem>>, %arg5: memref<10x128xf32, #tpu.memory_space<any>>, %arg6: memref<5x128xf32, #tpu.memory_space<vmem>>, %arg7: memref<1x1x8xi32, #tpu.memory_space<vmem>>, %arg8: memref<8x1xf32, #tpu.memory_space<vmem>>, %arg9: memref<2x8x128xf32, #tpu.memory_space<vmem>>, %arg10: memref<2x8x128xf32, #tpu.memory_space<vmem>>, %arg11: memref<2x2x!tpu.dma_semaphore, #tpu.memory_space<semaphore_mem>>) attributes {dimension_semantics = [#tpu.dimension_semantics<parallel>, #tpu.dimension_semantics<arbitrary>], iteration_bounds = array<i64: 1, 1>, scalar_prefetch = 3 : i64, scratch_operands = 3 : i64, tpu.core_type = #tpu.core_type<tc>, window_params = [{}, {pipeline_mode = #tpu.pipeline_mode<synchronous>, transform_indices = @transform_1, window_bounds = array<i64: 5, 128>}, {transform_indices = @transform_2, window_bounds = array<i64: 1, 1, 8>}, {transform_indices = @transform_3, window_bounds = array<i64: 8, 1>}]} {
    %c1_i32 = arith.constant 1 : i32
    %0 = arith.muli %arg0, %c1_i32 : i32
    %1 = arith.addi %0, %arg1 : i32
    %c2_i32 = arith.constant 2 : i32
    %c0_i32 = arith.constant 0 : i32
    %2 = arith.cmpi eq, %c2_i32, %c0_i32 : i32
    %c1_i32_0 = arith.constant 1 : i32
    %3 = arith.select %2, %c1_i32_0, %c2_i32 : i32
    %4 = arith.remsi %arg1, %3 : i32
    %c0_i32_1 = arith.constant 0 : i32
    %5 = arith.cmpi ne, %4, %c0_i32_1 : i32
    %c0_i32_2 = arith.constant 0 : i32
    %6 = arith.cmpi slt, %4, %c0_i32_2 : i32
    %c0_i32_3 = arith.constant 0 : i32
    %7 = arith.cmpi slt, %3, %c0_i32_3 : i32
    %8 = arith.xori %6, %7 : i1
    %9 = arith.andi %8, %5 : i1
    %10 = arith.addi %4, %3 : i32
    %11 = arith.select %9, %10, %4 : i32
    %c1_i32_4 = arith.constant 1 : i32
    %12 = arith.subi %c1_i32_4, %11 : i32
    %c0_i32_5 = arith.constant 0 : i32
    %13 = arith.cmpi eq, %arg1, %c0_i32_5 : i32
    %14 = arith.extui %13 : i1 to i32
    %c0_i32_6 = arith.constant 0 : i32
    %15 = arith.cmpi ne, %14, %c0_i32_6 : i32
    scf.if %15 {
      %c8_i32 = arith.constant 8 : i32
      %52 = arith.muli %1, %c8_i32 : i32
      %c0_i32_31 = arith.constant 0 : i32
      %53 = arith.addi %52, %c0_i32_31 : i32
      %54 = arith.index_cast %53 : i32 to index
      %55 = memref.load %arg2[%54] : memref<8xi32, #tpu.memory_space<smem>>
      %c0_i32_32 = arith.constant 0 : i32
      %c0_i32_33 = arith.constant 0 : i32
      %56 = tpu.memref_slice %arg5[%55, %c0_i32_33] : memref<10x128xf32, #tpu.memory_space<any>> -> memref<1x128xf32, #tpu.memory_space<any>>
      %c0_i32_34 = arith.constant 0 : i32
      %57 = tpu.memref_slice %arg9[%11, %c0_i32_31, %c0_i32_34] : memref<2x8x128xf32, #tpu.memory_space<vmem>> -> memref<1x1x128xf32, #tpu.memory_space<vmem>>
      %58 = tpu.memref_squeeze %57 : memref<1x1x128xf32, #tpu.memory_space<vmem>> -> memref<1x128xf32, #tpu.memory_space<vmem>>
      %59 = tpu.memref_slice %arg11[%11, %c0_i32_32] : memref<2x2x!tpu.dma_semaphore, #tpu.memory_space<semaphore_mem>> -> memref<1x1x!tpu.dma_semaphore, #tpu.memory_space<semaphore_mem>>
      %60 = tpu.memref_squeeze %59 : memref<1x1x!tpu.dma_semaphore, #tpu.memory_space<semaphore_mem>> -> memref<!tpu.dma_semaphore, #tpu.memory_space<semaphore_mem>>
      tpu.enqueue_dma source(%56 : memref<1x128xf32, #tpu.memory_space<any>>) target(%58 : memref<1x128xf32, #tpu.memory_space<vmem>>) target_semaphore(%60 : memref<!tpu.dma_semaphore, #tpu.memory_space<semaphore_mem>>)
      %61 = arith.addi %52, %c0_i32_31 : i32
      %62 = arith.index_cast %61 : i32 to index
      %63 = memref.load %arg4[%62] : memref<8xi32, #tpu.memory_space<smem>>
      %c1_i32_35 = arith.constant 1 : i32
      %c0_i32_36 = arith.constant 0 : i32
      %64 = tpu.memref_slice %arg5[%63, %c0_i32_36] : memref<10x128xf32, #tpu.memory_space<any>> -> memref<1x128xf32, #tpu.memory_space<any>>
      %c0_i32_37 = arith.constant 0 : i32
      %65 = tpu.memref_slice %arg10[%11, %c0_i32_31, %c0_i32_37] : memref<2x8x128xf32, #tpu.memory_space<vmem>> -> memref<1x1x128xf32, #tpu.memory_space<vmem>>
      %66 = tpu.memref_squeeze %65 : memref<1x1x128xf32, #tpu.memory_space<vmem>> -> memref<1x128xf32, #tpu.memory_space<vmem>>
      %67 = tpu.memref_slice %arg11[%11, %c1_i32_35] : memref<2x2x!tpu.dma_semaphore, #tpu.memory_space<semaphore_mem>> -> memref<1x1x!tpu.dma_semaphore, #tpu.memory_space<semaphore_mem>>
      %68 = tpu.memref_squeeze %67 : memref<1x1x!tpu.dma_semaphore, #tpu.memory_space<semaphore_mem>> -> memref<!tpu.dma_semaphore, #tpu.memory_space<semaphore_mem>>
      tpu.enqueue_dma source(%64 : memref<1x128xf32, #tpu.memory_space<any>>) target(%66 : memref<1x128xf32, #tpu.memory_space<vmem>>) target_semaphore(%68 : memref<!tpu.dma_semaphore, #tpu.memory_space<semaphore_mem>>)
      %c1_i32_38 = arith.constant 1 : i32
      %69 = arith.addi %52, %c1_i32_38 : i32
      %70 = arith.index_cast %69 : i32 to index
      %71 = memref.load %arg2[%70] : memref<8xi32, #tpu.memory_space<smem>>
      %c0_i32_39 = arith.constant 0 : i32
      %c0_i32_40 = arith.constant 0 : i32
      %72 = tpu.memref_slice %arg5[%71, %c0_i32_40] : memref<10x128xf32, #tpu.memory_space<any>> -> memref<1x128xf32, #tpu.memory_space<any>>
      %c0_i32_41 = arith.constant 0 : i32
      %73 = tpu.memref_slice %arg9[%11, %c1_i32_38, %c0_i32_41] : memref<2x8x128xf32, #tpu.memory_space<vmem>> -> memref<1x1x128xf32, #tpu.memory_space<vmem>>
      %74 = tpu.memref_squeeze %73 : memref<1x1x128xf32, #tpu.memory_space<vmem>> -> memref<1x128xf32, #tpu.memory_space<vmem>>
      %75 = tpu.memref_slice %arg11[%11, %c0_i32_39] : memref<2x2x!tpu.dma_semaphore, #tpu.memory_space<semaphore_mem>> -> memref<1x1x!tpu.dma_semaphore, #tpu.memory_space<semaphore_mem>>
      %76 = tpu.memref_squeeze %75 : memref<1x1x!tpu.dma_semaphore, #tpu.memory_space<semaphore_mem>> -> memref<!tpu.dma_semaphore, #tpu.memory_space<semaphore_mem>>
      tpu.enqueue_dma source(%72 : memref<1x128xf32, #tpu.memory_space<any>>) target(%74 : memref<1x128xf32, #tpu.memory_space<vmem>>) target_semaphore(%76 : memref<!tpu.dma_semaphore, #tpu.memory_space<semaphore_mem>>)
      %77 = arith.addi %52, %c1_i32_38 : i32
      %78 = arith.index_cast %77 : i32 to index
      %79 = memref.load %arg4[%78] : memref<8xi32, #tpu.memory_space<smem>>
      %c1_i32_42 = arith.constant 1 : i32
      %c0_i32_43 = arith.constant 0 : i32
      %80 = tpu.memref_slice %arg5[%79, %c0_i32_43] : memref<10x128xf32, #tpu.memory_space<any>> -> memref<1x128xf32, #tpu.memory_space<any>>
      %c0_i32_44 = arith.constant 0 : i32
      %81 = tpu.memref_slice %arg10[%11, %c1_i32_38, %c0_i32_44] : memref<2x8x128xf32, #tpu.memory_space<vmem>> -> memref<1x1x128xf32, #tpu.memory_space<vmem>>
      %82 = tpu.memref_squeeze %81 : memref<1x1x128xf32, #tpu.memory_space<vmem>> -> memref<1x128xf32, #tpu.memory_space<vmem>>
      %83 = tpu.memref_slice %arg11[%11, %c1_i32_42] : memref<2x2x!tpu.dma_semaphore, #tpu.memory_space<semaphore_mem>> -> memref<1x1x!tpu.dma_semaphore, #tpu.memory_space<semaphore_mem>>
      %84 = tpu.memref_squeeze %83 : memref<1x1x!tpu.dma_semaphore, #tpu.memory_space<semaphore_mem>> -> memref<!tpu.dma_semaphore, #tpu.memory_space<semaphore_mem>>
      tpu.enqueue_dma source(%80 : memref<1x128xf32, #tpu.memory_space<any>>) target(%82 : memref<1x128xf32, #tpu.memory_space<vmem>>) target_semaphore(%84 : memref<!tpu.dma_semaphore, #tpu.memory_space<semaphore_mem>>)
      %c2_i32_45 = arith.constant 2 : i32
      %85 = arith.addi %52, %c2_i32_45 : i32
      %86 = arith.index_cast %85 : i32 to index
      %87 = memref.load %arg2[%86] : memref<8xi32, #tpu.memory_space<smem>>
      %c0_i32_46 = arith.constant 0 : i32
      %c0_i32_47 = arith.constant 0 : i32
      %88 = tpu.memref_slice %arg5[%87, %c0_i32_47] : memref<10x128xf32, #tpu.memory_space<any>> -> memref<1x128xf32, #tpu.memory_space<any>>
      %c0_i32_48 = arith.constant 0 : i32
      %89 = tpu.memref_slice %arg9[%11, %c2_i32_45, %c0_i32_48] : memref<2x8x128xf32, #tpu.memory_space<vmem>> -> memref<1x1x128xf32, #tpu.memory_space<vmem>>
      %90 = tpu.memref_squeeze %89 : memref<1x1x128xf32, #tpu.memory_space<vmem>> -> memref<1x128xf32, #tpu.memory_space<vmem>>
      %91 = tpu.memref_slice %arg11[%11, %c0_i32_46] : memref<2x2x!tpu.dma_semaphore, #tpu.memory_space<semaphore_mem>> -> memref<1x1x!tpu.dma_semaphore, #tpu.memory_space<semaphore_mem>>
      %92 = tpu.memref_squeeze %91 : memref<1x1x!tpu.dma_semaphore, #tpu.memory_space<semaphore_mem>> -> memref<!tpu.dma_semaphore, #tpu.memory_space<semaphore_mem>>
      tpu.enqueue_dma source(%88 : memref<1x128xf32, #tpu.memory_space<any>>) target(%90 : memref<1x128xf32, #tpu.memory_space<vmem>>) target_semaphore(%92 : memref<!tpu.dma_semaphore, #tpu.memory_space<semaphore_mem>>)
      %93 = arith.addi %52, %c2_i32_45 : i32
      %94 = arith.index_cast %93 : i32 to index
      %95 = memref.load %arg4[%94] : memref<8xi32, #tpu.memory_space<smem>>
      %c1_i32_49 = arith.constant 1 : i32
      %c0_i32_50 = arith.constant 0 : i32
      %96 = tpu.memref_slice %arg5[%95, %c0_i32_50] : memref<10x128xf32, #tpu.memory_space<any>> -> memref<1x128xf32, #tpu.memory_space<any>>
      %c0_i32_51 = arith.constant 0 : i32
      %97 = tpu.memref_slice %arg10[%11, %c2_i32_45, %c0_i32_51] : memref<2x8x128xf32, #tpu.memory_space<vmem>> -> memref<1x1x128xf32, #tpu.memory_space<vmem>>
      %98 = tpu.memref_squeeze %97 : memref<1x1x128xf32, #tpu.memory_space<vmem>> -> memref<1x128xf32, #tpu.memory_space<vmem>>
      %99 = tpu.memref_slice %arg11[%11, %c1_i32_49] : memref<2x2x!tpu.dma_semaphore, #tpu.memory_space<semaphore_mem>> -> memref<1x1x!tpu.dma_semaphore, #tpu.memory_space<semaphore_mem>>
      %100 = tpu.memref_squeeze %99 : memref<1x1x!tpu.dma_semaphore, #tpu.memory_space<semaphore_mem>> -> memref<!tpu.dma_semaphore, #tpu.memory_space<semaphore_mem>>
      tpu.enqueue_dma source(%96 : memref<1x128xf32, #tpu.memory_space<any>>) target(%98 : memref<1x128xf32, #tpu.memory_space<vmem>>) target_semaphore(%100 : memref<!tpu.dma_semaphore, #tpu.memory_space<semaphore_mem>>)
      %c3_i32 = arith.constant 3 : i32
      %101 = arith.addi %52, %c3_i32 : i32
      %102 = arith.index_cast %101 : i32 to index
      %103 = memref.load %arg2[%102] : memref<8xi32, #tpu.memory_space<smem>>
      %c0_i32_52 = arith.constant 0 : i32
      %c0_i32_53 = arith.constant 0 : i32
      %104 = tpu.memref_slice %arg5[%103, %c0_i32_53] : memref<10x128xf32, #tpu.memory_space<any>> -> memref<1x128xf32, #tpu.memory_space<any>>
      %c0_i32_54 = arith.constant 0 : i32
      %105 = tpu.memref_slice %arg9[%11, %c3_i32, %c0_i32_54] : memref<2x8x128xf32, #tpu.memory_space<vmem>> -> memref<1x1x128xf32, #tpu.memory_space<vmem>>
      %106 = tpu.memref_squeeze %105 : memref<1x1x128xf32, #tpu.memory_space<vmem>> -> memref<1x128xf32, #tpu.memory_space<vmem>>
      %107 = tpu.memref_slice %arg11[%11, %c0_i32_52] : memref<2x2x!tpu.dma_semaphore, #tpu.memory_space<semaphore_mem>> -> memref<1x1x!tpu.dma_semaphore, #tpu.memory_space<semaphore_mem>>
      %108 = tpu.memref_squeeze %107 : memref<1x1x!tpu.dma_semaphore, #tpu.memory_space<semaphore_mem>> -> memref<!tpu.dma_semaphore, #tpu.memory_space<semaphore_mem>>
      tpu.enqueue_dma source(%104 : memref<1x128xf32, #tpu.memory_space<any>>) target(%106 : memref<1x128xf32, #tpu.memory_space<vmem>>) target_semaphore(%108 : memref<!tpu.dma_semaphore, #tpu.memory_space<semaphore_mem>>)
      %109 = arith.addi %52, %c3_i32 : i32
      %110 = arith.index_cast %109 : i32 to index
      %111 = memref.load %arg4[%110] : memref<8xi32, #tpu.memory_space<smem>>
      %c1_i32_55 = arith.constant 1 : i32
      %c0_i32_56 = arith.constant 0 : i32
      %112 = tpu.memref_slice %arg5[%111, %c0_i32_56] : memref<10x128xf32, #tpu.memory_space<any>> -> memref<1x128xf32, #tpu.memory_space<any>>
      %c0_i32_57 = arith.constant 0 : i32
      %113 = tpu.memref_slice %arg10[%11, %c3_i32, %c0_i32_57] : memref<2x8x128xf32, #tpu.memory_space<vmem>> -> memref<1x1x128xf32, #tpu.memory_space<vmem>>
      %114 = tpu.memref_squeeze %113 : memref<1x1x128xf32, #tpu.memory_space<vmem>> -> memref<1x128xf32, #tpu.memory_space<vmem>>
      %115 = tpu.memref_slice %arg11[%11, %c1_i32_55] : memref<2x2x!tpu.dma_semaphore, #tpu.memory_space<semaphore_mem>> -> memref<1x1x!tpu.dma_semaphore, #tpu.memory_space<semaphore_mem>>
      %116 = tpu.memref_squeeze %115 : memref<1x1x!tpu.dma_semaphore, #tpu.memory_space<semaphore_mem>> -> memref<!tpu.dma_semaphore, #tpu.memory_space<semaphore_mem>>
      tpu.enqueue_dma source(%112 : memref<1x128xf32, #tpu.memory_space<any>>) target(%114 : memref<1x128xf32, #tpu.memory_space<vmem>>) target_semaphore(%116 : memref<!tpu.dma_semaphore, #tpu.memory_space<semaphore_mem>>)
      %c4_i32 = arith.constant 4 : i32
      %117 = arith.addi %52, %c4_i32 : i32
      %118 = arith.index_cast %117 : i32 to index
      %119 = memref.load %arg2[%118] : memref<8xi32, #tpu.memory_space<smem>>
      %c0_i32_58 = arith.constant 0 : i32
      %c0_i32_59 = arith.constant 0 : i32
      %120 = tpu.memref_slice %arg5[%119, %c0_i32_59] : memref<10x128xf32, #tpu.memory_space<any>> -> memref<1x128xf32, #tpu.memory_space<any>>
      %c0_i32_60 = arith.constant 0 : i32
      %121 = tpu.memref_slice %arg9[%11, %c4_i32, %c0_i32_60] : memref<2x8x128xf32, #tpu.memory_space<vmem>> -> memref<1x1x128xf32, #tpu.memory_space<vmem>>
      %122 = tpu.memref_squeeze %121 : memref<1x1x128xf32, #tpu.memory_space<vmem>> -> memref<1x128xf32, #tpu.memory_space<vmem>>
      %123 = tpu.memref_slice %arg11[%11, %c0_i32_58] : memref<2x2x!tpu.dma_semaphore, #tpu.memory_space<semaphore_mem>> -> memref<1x1x!tpu.dma_semaphore, #tpu.memory_space<semaphore_mem>>
      %124 = tpu.memref_squeeze %123 : memref<1x1x!tpu.dma_semaphore, #tpu.memory_space<semaphore_mem>> -> memref<!tpu.dma_semaphore, #tpu.memory_space<semaphore_mem>>
      tpu.enqueue_dma source(%120 : memref<1x128xf32, #tpu.memory_space<any>>) target(%122 : memref<1x128xf32, #tpu.memory_space<vmem>>) target_semaphore(%124 : memref<!tpu.dma_semaphore, #tpu.memory_space<semaphore_mem>>)
      %125 = arith.addi %52, %c4_i32 : i32
      %126 = arith.index_cast %125 : i32 to index
      %127 = memref.load %arg4[%126] : memref<8xi32, #tpu.memory_space<smem>>
      %c1_i32_61 = arith.constant 1 : i32
      %c0_i32_62 = arith.constant 0 : i32
      %128 = tpu.memref_slice %arg5[%127, %c0_i32_62] : memref<10x128xf32, #tpu.memory_space<any>> -> memref<1x128xf32, #tpu.memory_space<any>>
      %c0_i32_63 = arith.constant 0 : i32
      %129 = tpu.memref_slice %arg10[%11, %c4_i32, %c0_i32_63] : memref<2x8x128xf32, #tpu.memory_space<vmem>> -> memref<1x1x128xf32, #tpu.memory_space<vmem>>
      %130 = tpu.memref_squeeze %129 : memref<1x1x128xf32, #tpu.memory_space<vmem>> -> memref<1x128xf32, #tpu.memory_space<vmem>>
      %131 = tpu.memref_slice %arg11[%11, %c1_i32_61] : memref<2x2x!tpu.dma_semaphore, #tpu.memory_space<semaphore_mem>> -> memref<1x1x!tpu.dma_semaphore, #tpu.memory_space<semaphore_mem>>
      %132 = tpu.memref_squeeze %131 : memref<1x1x!tpu.dma_semaphore, #tpu.memory_space<semaphore_mem>> -> memref<!tpu.dma_semaphore, #tpu.memory_space<semaphore_mem>>
      tpu.enqueue_dma source(%128 : memref<1x128xf32, #tpu.memory_space<any>>) target(%130 : memref<1x128xf32, #tpu.memory_space<vmem>>) target_semaphore(%132 : memref<!tpu.dma_semaphore, #tpu.memory_space<semaphore_mem>>)
      %c5_i32 = arith.constant 5 : i32
      %133 = arith.addi %52, %c5_i32 : i32
      %134 = arith.index_cast %133 : i32 to index
      %135 = memref.load %arg2[%134] : memref<8xi32, #tpu.memory_space<smem>>
      %c0_i32_64 = arith.constant 0 : i32
      %c0_i32_65 = arith.constant 0 : i32
      %136 = tpu.memref_slice %arg5[%135, %c0_i32_65] : memref<10x128xf32, #tpu.memory_space<any>> -> memref<1x128xf32, #tpu.memory_space<any>>
      %c0_i32_66 = arith.constant 0 : i32
      %137 = tpu.memref_slice %arg9[%11, %c5_i32, %c0_i32_66] : memref<2x8x128xf32, #tpu.memory_space<vmem>> -> memref<1x1x128xf32, #tpu.memory_space<vmem>>
      %138 = tpu.memref_squeeze %137 : memref<1x1x128xf32, #tpu.memory_space<vmem>> -> memref<1x128xf32, #tpu.memory_space<vmem>>
      %139 = tpu.memref_slice %arg11[%11, %c0_i32_64] : memref<2x2x!tpu.dma_semaphore, #tpu.memory_space<semaphore_mem>> -> memref<1x1x!tpu.dma_semaphore, #tpu.memory_space<semaphore_mem>>
      %140 = tpu.memref_squeeze %139 : memref<1x1x!tpu.dma_semaphore, #tpu.memory_space<semaphore_mem>> -> memref<!tpu.dma_semaphore, #tpu.memory_space<semaphore_mem>>
      tpu.enqueue_dma source(%136 : memref<1x128xf32, #tpu.memory_space<any>>) target(%138 : memref<1x128xf32, #tpu.memory_space<vmem>>) target_semaphore(%140 : memref<!tpu.dma_semaphore, #tpu.memory_space<semaphore_mem>>)
      %141 = arith.addi %52, %c5_i32 : i32
      %142 = arith.index_cast %141 : i32 to index
      %143 = memref.load %arg4[%142] : memref<8xi32, #tpu.memory_space<smem>>
      %c1_i32_67 = arith.constant 1 : i32
      %c0_i32_68 = arith.constant 0 : i32
      %144 = tpu.memref_slice %arg5[%143, %c0_i32_68] : memref<10x128xf32, #tpu.memory_space<any>> -> memref<1x128xf32, #tpu.memory_space<any>>
      %c0_i32_69 = arith.constant 0 : i32
      %145 = tpu.memref_slice %arg10[%11, %c5_i32, %c0_i32_69] : memref<2x8x128xf32, #tpu.memory_space<vmem>> -> memref<1x1x128xf32, #tpu.memory_space<vmem>>
      %146 = tpu.memref_squeeze %145 : memref<1x1x128xf32, #tpu.memory_space<vmem>> -> memref<1x128xf32, #tpu.memory_space<vmem>>
      %147 = tpu.memref_slice %arg11[%11, %c1_i32_67] : memref<2x2x!tpu.dma_semaphore, #tpu.memory_space<semaphore_mem>> -> memref<1x1x!tpu.dma_semaphore, #tpu.memory_space<semaphore_mem>>
      %148 = tpu.memref_squeeze %147 : memref<1x1x!tpu.dma_semaphore, #tpu.memory_space<semaphore_mem>> -> memref<!tpu.dma_semaphore, #tpu.memory_space<semaphore_mem>>
      tpu.enqueue_dma source(%144 : memref<1x128xf32, #tpu.memory_space<any>>) target(%146 : memref<1x128xf32, #tpu.memory_space<vmem>>) target_semaphore(%148 : memref<!tpu.dma_semaphore, #tpu.memory_space<semaphore_mem>>)
      %c6_i32 = arith.constant 6 : i32
      %149 = arith.addi %52, %c6_i32 : i32
      %150 = arith.index_cast %149 : i32 to index
      %151 = memref.load %arg2[%150] : memref<8xi32, #tpu.memory_space<smem>>
      %c0_i32_70 = arith.constant 0 : i32
      %c0_i32_71 = arith.constant 0 : i32
      %152 = tpu.memref_slice %arg5[%151, %c0_i32_71] : memref<10x128xf32, #tpu.memory_space<any>> -> memref<1x128xf32, #tpu.memory_space<any>>
      %c0_i32_72 = arith.constant 0 : i32
      %153 = tpu.memref_slice %arg9[%11, %c6_i32, %c0_i32_72] : memref<2x8x128xf32, #tpu.memory_space<vmem>> -> memref<1x1x128xf32, #tpu.memory_space<vmem>>
      %154 = tpu.memref_squeeze %153 : memref<1x1x128xf32, #tpu.memory_space<vmem>> -> memref<1x128xf32, #tpu.memory_space<vmem>>
      %155 = tpu.memref_slice %arg11[%11, %c0_i32_70] : memref<2x2x!tpu.dma_semaphore, #tpu.memory_space<semaphore_mem>> -> memref<1x1x!tpu.dma_semaphore, #tpu.memory_space<semaphore_mem>>
      %156 = tpu.memref_squeeze %155 : memref<1x1x!tpu.dma_semaphore, #tpu.memory_space<semaphore_mem>> -> memref<!tpu.dma_semaphore, #tpu.memory_space<semaphore_mem>>
      tpu.enqueue_dma source(%152 : memref<1x128xf32, #tpu.memory_space<any>>) target(%154 : memref<1x128xf32, #tpu.memory_space<vmem>>) target_semaphore(%156 : memref<!tpu.dma_semaphore, #tpu.memory_space<semaphore_mem>>)
      %157 = arith.addi %52, %c6_i32 : i32
      %158 = arith.index_cast %157 : i32 to index
      %159 = memref.load %arg4[%158] : memref<8xi32, #tpu.memory_space<smem>>
      %c1_i32_73 = arith.constant 1 : i32
      %c0_i32_74 = arith.constant 0 : i32
      %160 = tpu.memref_slice %arg5[%159, %c0_i32_74] : memref<10x128xf32, #tpu.memory_space<any>> -> memref<1x128xf32, #tpu.memory_space<any>>
      %c0_i32_75 = arith.constant 0 : i32
      %161 = tpu.memref_slice %arg10[%11, %c6_i32, %c0_i32_75] : memref<2x8x128xf32, #tpu.memory_space<vmem>> -> memref<1x1x128xf32, #tpu.memory_space<vmem>>
      %162 = tpu.memref_squeeze %161 : memref<1x1x128xf32, #tpu.memory_space<vmem>> -> memref<1x128xf32, #tpu.memory_space<vmem>>
      %163 = tpu.memref_slice %arg11[%11, %c1_i32_73] : memref<2x2x!tpu.dma_semaphore, #tpu.memory_space<semaphore_mem>> -> memref<1x1x!tpu.dma_semaphore, #tpu.memory_space<semaphore_mem>>
      %164 = tpu.memref_squeeze %163 : memref<1x1x!tpu.dma_semaphore, #tpu.memory_space<semaphore_mem>> -> memref<!tpu.dma_semaphore, #tpu.memory_space<semaphore_mem>>
      tpu.enqueue_dma source(%160 : memref<1x128xf32, #tpu.memory_space<any>>) target(%162 : memref<1x128xf32, #tpu.memory_space<vmem>>) target_semaphore(%164 : memref<!tpu.dma_semaphore, #tpu.memory_space<semaphore_mem>>)
      %c7_i32 = arith.constant 7 : i32
      %165 = arith.addi %52, %c7_i32 : i32
      %166 = arith.index_cast %165 : i32 to index
      %167 = memref.load %arg2[%166] : memref<8xi32, #tpu.memory_space<smem>>
      %c0_i32_76 = arith.constant 0 : i32
      %c0_i32_77 = arith.constant 0 : i32
      %168 = tpu.memref_slice %arg5[%167, %c0_i32_77] : memref<10x128xf32, #tpu.memory_space<any>> -> memref<1x128xf32, #tpu.memory_space<any>>
      %c0_i32_78 = arith.constant 0 : i32
      %169 = tpu.memref_slice %arg9[%11, %c7_i32, %c0_i32_78] : memref<2x8x128xf32, #tpu.memory_space<vmem>> -> memref<1x1x128xf32, #tpu.memory_space<vmem>>
      %170 = tpu.memref_squeeze %169 : memref<1x1x128xf32, #tpu.memory_space<vmem>> -> memref<1x128xf32, #tpu.memory_space<vmem>>
      %171 = tpu.memref_slice %arg11[%11, %c0_i32_76] : memref<2x2x!tpu.dma_semaphore, #tpu.memory_space<semaphore_mem>> -> memref<1x1x!tpu.dma_semaphore, #tpu.memory_space<semaphore_mem>>
      %172 = tpu.memref_squeeze %171 : memref<1x1x!tpu.dma_semaphore, #tpu.memory_space<semaphore_mem>> -> memref<!tpu.dma_semaphore, #tpu.memory_space<semaphore_mem>>
      tpu.enqueue_dma source(%168 : memref<1x128xf32, #tpu.memory_space<any>>) target(%170 : memref<1x128xf32, #tpu.memory_space<vmem>>) target_semaphore(%172 : memref<!tpu.dma_semaphore, #tpu.memory_space<semaphore_mem>>)
      %173 = arith.addi %52, %c7_i32 : i32
      %174 = arith.index_cast %173 : i32 to index
      %175 = memref.load %arg4[%174] : memref<8xi32, #tpu.memory_space<smem>>
      %c1_i32_79 = arith.constant 1 : i32
      %c0_i32_80 = arith.constant 0 : i32
      %176 = tpu.memref_slice %arg5[%175, %c0_i32_80] : memref<10x128xf32, #tpu.memory_space<any>> -> memref<1x128xf32, #tpu.memory_space<any>>
      %c0_i32_81 = arith.constant 0 : i32
      %177 = tpu.memref_slice %arg10[%11, %c7_i32, %c0_i32_81] : memref<2x8x128xf32, #tpu.memory_space<vmem>> -> memref<1x1x128xf32, #tpu.memory_space<vmem>>
      %178 = tpu.memref_squeeze %177 : memref<1x1x128xf32, #tpu.memory_space<vmem>> -> memref<1x128xf32, #tpu.memory_space<vmem>>
      %179 = tpu.memref_slice %arg11[%11, %c1_i32_79] : memref<2x2x!tpu.dma_semaphore, #tpu.memory_space<semaphore_mem>> -> memref<1x1x!tpu.dma_semaphore, #tpu.memory_space<semaphore_mem>>
      %180 = tpu.memref_squeeze %179 : memref<1x1x!tpu.dma_semaphore, #tpu.memory_space<semaphore_mem>> -> memref<!tpu.dma_semaphore, #tpu.memory_space<semaphore_mem>>
      tpu.enqueue_dma source(%176 : memref<1x128xf32, #tpu.memory_space<any>>) target(%178 : memref<1x128xf32, #tpu.memory_space<vmem>>) target_semaphore(%180 : memref<!tpu.dma_semaphore, #tpu.memory_space<semaphore_mem>>)
      %c8_i32_82 = arith.constant 8 : i32
    } else {
    }
    %c1_i32_7 = arith.constant 1 : i32
    %16 = arith.addi %arg1, %c1_i32_7 : i32
    %c1_i32_8 = arith.constant 1 : i32
    %17 = arith.cmpi slt, %16, %c1_i32_8 : i32
    %18 = arith.extui %17 : i1 to i32
    %c0_i32_9 = arith.constant 0 : i32
    %19 = arith.cmpi ne, %18, %c0_i32_9 : i32
    scf.if %19 {
      %c1_i32_31 = arith.constant 1 : i32
      %52 = arith.addi %1, %c1_i32_31 : i32
      %c8_i32 = arith.constant 8 : i32
      %53 = arith.muli %52, %c8_i32 : i32
      %c0_i32_32 = arith.constant 0 : i32
      %54 = arith.addi %53, %c0_i32_32 : i32
      %55 = arith.index_cast %54 : i32 to index
      %56 = memref.load %arg2[%55] : memref<8xi32, #tpu.memory_space<smem>>
      %c0_i32_33 = arith.constant 0 : i32
      %c0_i32_34 = arith.constant 0 : i32
      %57 = tpu.memref_slice %arg5[%56, %c0_i32_34] : memref<10x128xf32, #tpu.memory_space<any>> -> memref<1x128xf32, #tpu.memory_space<any>>
      %c0_i32_35 = arith.constant 0 : i32
      %58 = tpu.memref_slice %arg9[%12, %c0_i32_32, %c0_i32_35] : memref<2x8x128xf32, #tpu.memory_space<vmem>> -> memref<1x1x128xf32, #tpu.memory_space<vmem>>
      %59 = tpu.memref_squeeze %58 : memref<1x1x128xf32, #tpu.memory_space<vmem>> -> memref<1x128xf32, #tpu.memory_space<vmem>>
      %60 = tpu.memref_slice %arg11[%12, %c0_i32_33] : memref<2x2x!tpu.dma_semaphore, #tpu.memory_space<semaphore_mem>> -> memref<1x1x!tpu.dma_semaphore, #tpu.memory_space<semaphore_mem>>
      %61 = tpu.memref_squeeze %60 : memref<1x1x!tpu.dma_semaphore, #tpu.memory_space<semaphore_mem>> -> memref<!tpu.dma_semaphore, #tpu.memory_space<semaphore_mem>>
      tpu.enqueue_dma source(%57 : memref<1x128xf32, #tpu.memory_space<any>>) target(%59 : memref<1x128xf32, #tpu.memory_space<vmem>>) target_semaphore(%61 : memref<!tpu.dma_semaphore, #tpu.memory_space<semaphore_mem>>)
      %62 = arith.addi %53, %c0_i32_32 : i32
      %63 = arith.index_cast %62 : i32 to index
      %64 = memref.load %arg4[%63] : memref<8xi32, #tpu.memory_space<smem>>
      %c1_i32_36 = arith.constant 1 : i32
      %c0_i32_37 = arith.constant 0 : i32
      %65 = tpu.memref_slice %arg5[%64, %c0_i32_37] : memref<10x128xf32, #tpu.memory_space<any>> -> memref<1x128xf32, #tpu.memory_space<any>>
      %c0_i32_38 = arith.constant 0 : i32
      %66 = tpu.memref_slice %arg10[%12, %c0_i32_32, %c0_i32_38] : memref<2x8x128xf32, #tpu.memory_space<vmem>> -> memref<1x1x128xf32, #tpu.memory_space<vmem>>
      %67 = tpu.memref_squeeze %66 : memref<1x1x128xf32, #tpu.memory_space<vmem>> -> memref<1x128xf32, #tpu.memory_space<vmem>>
      %68 = tpu.memref_slice %arg11[%12, %c1_i32_36] : memref<2x2x!tpu.dma_semaphore, #tpu.memory_space<semaphore_mem>> -> memref<1x1x!tpu.dma_semaphore, #tpu.memory_space<semaphore_mem>>
      %69 = tpu.memref_squeeze %68 : memref<1x1x!tpu.dma_semaphore, #tpu.memory_space<semaphore_mem>> -> memref<!tpu.dma_semaphore, #tpu.memory_space<semaphore_mem>>
      tpu.enqueue_dma source(%65 : memref<1x128xf32, #tpu.memory_space<any>>) target(%67 : memref<1x128xf32, #tpu.memory_space<vmem>>) target_semaphore(%69 : memref<!tpu.dma_semaphore, #tpu.memory_space<semaphore_mem>>)
      %c1_i32_39 = arith.constant 1 : i32
      %70 = arith.addi %53, %c1_i32_39 : i32
      %71 = arith.index_cast %70 : i32 to index
      %72 = memref.load %arg2[%71] : memref<8xi32, #tpu.memory_space<smem>>
      %c0_i32_40 = arith.constant 0 : i32
      %c0_i32_41 = arith.constant 0 : i32
      %73 = tpu.memref_slice %arg5[%72, %c0_i32_41] : memref<10x128xf32, #tpu.memory_space<any>> -> memref<1x128xf32, #tpu.memory_space<any>>
      %c0_i32_42 = arith.constant 0 : i32
      %74 = tpu.memref_slice %arg9[%12, %c1_i32_39, %c0_i32_42] : memref<2x8x128xf32, #tpu.memory_space<vmem>> -> memref<1x1x128xf32, #tpu.memory_space<vmem>>
      %75 = tpu.memref_squeeze %74 : memref<1x1x128xf32, #tpu.memory_space<vmem>> -> memref<1x128xf32, #tpu.memory_space<vmem>>
      %76 = tpu.memref_slice %arg11[%12, %c0_i32_40] : memref<2x2x!tpu.dma_semaphore, #tpu.memory_space<semaphore_mem>> -> memref<1x1x!tpu.dma_semaphore, #tpu.memory_space<semaphore_mem>>
      %77 = tpu.memref_squeeze %76 : memref<1x1x!tpu.dma_semaphore, #tpu.memory_space<semaphore_mem>> -> memref<!tpu.dma_semaphore, #tpu.memory_space<semaphore_mem>>
      tpu.enqueue_dma source(%73 : memref<1x128xf32, #tpu.memory_space<any>>) target(%75 : memref<1x128xf32, #tpu.memory_space<vmem>>) target_semaphore(%77 : memref<!tpu.dma_semaphore, #tpu.memory_space<semaphore_mem>>)
      %78 = arith.addi %53, %c1_i32_39 : i32
      %79 = arith.index_cast %78 : i32 to index
      %80 = memref.load %arg4[%79] : memref<8xi32, #tpu.memory_space<smem>>
      %c1_i32_43 = arith.constant 1 : i32
      %c0_i32_44 = arith.constant 0 : i32
      %81 = tpu.memref_slice %arg5[%80, %c0_i32_44] : memref<10x128xf32, #tpu.memory_space<any>> -> memref<1x128xf32, #tpu.memory_space<any>>
      %c0_i32_45 = arith.constant 0 : i32
      %82 = tpu.memref_slice %arg10[%12, %c1_i32_39, %c0_i32_45] : memref<2x8x128xf32, #tpu.memory_space<vmem>> -> memref<1x1x128xf32, #tpu.memory_space<vmem>>
      %83 = tpu.memref_squeeze %82 : memref<1x1x128xf32, #tpu.memory_space<vmem>> -> memref<1x128xf32, #tpu.memory_space<vmem>>
      %84 = tpu.memref_slice %arg11[%12, %c1_i32_43] : memref<2x2x!tpu.dma_semaphore, #tpu.memory_space<semaphore_mem>> -> memref<1x1x!tpu.dma_semaphore, #tpu.memory_space<semaphore_mem>>
      %85 = tpu.memref_squeeze %84 : memref<1x1x!tpu.dma_semaphore, #tpu.memory_space<semaphore_mem>> -> memref<!tpu.dma_semaphore, #tpu.memory_space<semaphore_mem>>
      tpu.enqueue_dma source(%81 : memref<1x128xf32, #tpu.memory_space<any>>) target(%83 : memref<1x128xf32, #tpu.memory_space<vmem>>) target_semaphore(%85 : memref<!tpu.dma_semaphore, #tpu.memory_space<semaphore_mem>>)
      %c2_i32_46 = arith.constant 2 : i32
      %86 = arith.addi %53, %c2_i32_46 : i32
      %87 = arith.index_cast %86 : i32 to index
      %88 = memref.load %arg2[%87] : memref<8xi32, #tpu.memory_space<smem>>
      %c0_i32_47 = arith.constant 0 : i32
      %c0_i32_48 = arith.constant 0 : i32
      %89 = tpu.memref_slice %arg5[%88, %c0_i32_48] : memref<10x128xf32, #tpu.memory_space<any>> -> memref<1x128xf32, #tpu.memory_space<any>>
      %c0_i32_49 = arith.constant 0 : i32
      %90 = tpu.memref_slice %arg9[%12, %c2_i32_46, %c0_i32_49] : memref<2x8x128xf32, #tpu.memory_space<vmem>> -> memref<1x1x128xf32, #tpu.memory_space<vmem>>
      %91 = tpu.memref_squeeze %90 : memref<1x1x128xf32, #tpu.memory_space<vmem>> -> memref<1x128xf32, #tpu.memory_space<vmem>>
      %92 = tpu.memref_slice %arg11[%12, %c0_i32_47] : memref<2x2x!tpu.dma_semaphore, #tpu.memory_space<semaphore_mem>> -> memref<1x1x!tpu.dma_semaphore, #tpu.memory_space<semaphore_mem>>
      %93 = tpu.memref_squeeze %92 : memref<1x1x!tpu.dma_semaphore, #tpu.memory_space<semaphore_mem>> -> memref<!tpu.dma_semaphore, #tpu.memory_space<semaphore_mem>>
      tpu.enqueue_dma source(%89 : memref<1x128xf32, #tpu.memory_space<any>>) target(%91 : memref<1x128xf32, #tpu.memory_space<vmem>>) target_semaphore(%93 : memref<!tpu.dma_semaphore, #tpu.memory_space<semaphore_mem>>)
      %94 = arith.addi %53, %c2_i32_46 : i32
      %95 = arith.index_cast %94 : i32 to index
      %96 = memref.load %arg4[%95] : memref<8xi32, #tpu.memory_space<smem>>
      %c1_i32_50 = arith.constant 1 : i32
      %c0_i32_51 = arith.constant 0 : i32
      %97 = tpu.memref_slice %arg5[%96, %c0_i32_51] : memref<10x128xf32, #tpu.memory_space<any>> -> memref<1x128xf32, #tpu.memory_space<any>>
      %c0_i32_52 = arith.constant 0 : i32
      %98 = tpu.memref_slice %arg10[%12, %c2_i32_46, %c0_i32_52] : memref<2x8x128xf32, #tpu.memory_space<vmem>> -> memref<1x1x128xf32, #tpu.memory_space<vmem>>
      %99 = tpu.memref_squeeze %98 : memref<1x1x128xf32, #tpu.memory_space<vmem>> -> memref<1x128xf32, #tpu.memory_space<vmem>>
      %100 = tpu.memref_slice %arg11[%12, %c1_i32_50] : memref<2x2x!tpu.dma_semaphore, #tpu.memory_space<semaphore_mem>> -> memref<1x1x!tpu.dma_semaphore, #tpu.memory_space<semaphore_mem>>
      %101 = tpu.memref_squeeze %100 : memref<1x1x!tpu.dma_semaphore, #tpu.memory_space<semaphore_mem>> -> memref<!tpu.dma_semaphore, #tpu.memory_space<semaphore_mem>>
      tpu.enqueue_dma source(%97 : memref<1x128xf32, #tpu.memory_space<any>>) target(%99 : memref<1x128xf32, #tpu.memory_space<vmem>>) target_semaphore(%101 : memref<!tpu.dma_semaphore, #tpu.memory_space<semaphore_mem>>)
      %c3_i32 = arith.constant 3 : i32
      %102 = arith.addi %53, %c3_i32 : i32
      %103 = arith.index_cast %102 : i32 to index
      %104 = memref.load %arg2[%103] : memref<8xi32, #tpu.memory_space<smem>>
      %c0_i32_53 = arith.constant 0 : i32
      %c0_i32_54 = arith.constant 0 : i32
      %105 = tpu.memref_slice %arg5[%104, %c0_i32_54] : memref<10x128xf32, #tpu.memory_space<any>> -> memref<1x128xf32, #tpu.memory_space<any>>
      %c0_i32_55 = arith.constant 0 : i32
      %106 = tpu.memref_slice %arg9[%12, %c3_i32, %c0_i32_55] : memref<2x8x128xf32, #tpu.memory_space<vmem>> -> memref<1x1x128xf32, #tpu.memory_space<vmem>>
      %107 = tpu.memref_squeeze %106 : memref<1x1x128xf32, #tpu.memory_space<vmem>> -> memref<1x128xf32, #tpu.memory_space<vmem>>
      %108 = tpu.memref_slice %arg11[%12, %c0_i32_53] : memref<2x2x!tpu.dma_semaphore, #tpu.memory_space<semaphore_mem>> -> memref<1x1x!tpu.dma_semaphore, #tpu.memory_space<semaphore_mem>>
      %109 = tpu.memref_squeeze %108 : memref<1x1x!tpu.dma_semaphore, #tpu.memory_space<semaphore_mem>> -> memref<!tpu.dma_semaphore, #tpu.memory_space<semaphore_mem>>
      tpu.enqueue_dma source(%105 : memref<1x128xf32, #tpu.memory_space<any>>) target(%107 : memref<1x128xf32, #tpu.memory_space<vmem>>) target_semaphore(%109 : memref<!tpu.dma_semaphore, #tpu.memory_space<semaphore_mem>>)
      %110 = arith.addi %53, %c3_i32 : i32
      %111 = arith.index_cast %110 : i32 to index
      %112 = memref.load %arg4[%111] : memref<8xi32, #tpu.memory_space<smem>>
      %c1_i32_56 = arith.constant 1 : i32
      %c0_i32_57 = arith.constant 0 : i32
      %113 = tpu.memref_slice %arg5[%112, %c0_i32_57] : memref<10x128xf32, #tpu.memory_space<any>> -> memref<1x128xf32, #tpu.memory_space<any>>
      %c0_i32_58 = arith.constant 0 : i32
      %114 = tpu.memref_slice %arg10[%12, %c3_i32, %c0_i32_58] : memref<2x8x128xf32, #tpu.memory_space<vmem>> -> memref<1x1x128xf32, #tpu.memory_space<vmem>>
      %115 = tpu.memref_squeeze %114 : memref<1x1x128xf32, #tpu.memory_space<vmem>> -> memref<1x128xf32, #tpu.memory_space<vmem>>
      %116 = tpu.memref_slice %arg11[%12, %c1_i32_56] : memref<2x2x!tpu.dma_semaphore, #tpu.memory_space<semaphore_mem>> -> memref<1x1x!tpu.dma_semaphore, #tpu.memory_space<semaphore_mem>>
      %117 = tpu.memref_squeeze %116 : memref<1x1x!tpu.dma_semaphore, #tpu.memory_space<semaphore_mem>> -> memref<!tpu.dma_semaphore, #tpu.memory_space<semaphore_mem>>
      tpu.enqueue_dma source(%113 : memref<1x128xf32, #tpu.memory_space<any>>) target(%115 : memref<1x128xf32, #tpu.memory_space<vmem>>) target_semaphore(%117 : memref<!tpu.dma_semaphore, #tpu.memory_space<semaphore_mem>>)
      %c4_i32 = arith.constant 4 : i32
      %118 = arith.addi %53, %c4_i32 : i32
      %119 = arith.index_cast %118 : i32 to index
      %120 = memref.load %arg2[%119] : memref<8xi32, #tpu.memory_space<smem>>
      %c0_i32_59 = arith.constant 0 : i32
      %c0_i32_60 = arith.constant 0 : i32
      %121 = tpu.memref_slice %arg5[%120, %c0_i32_60] : memref<10x128xf32, #tpu.memory_space<any>> -> memref<1x128xf32, #tpu.memory_space<any>>
      %c0_i32_61 = arith.constant 0 : i32
      %122 = tpu.memref_slice %arg9[%12, %c4_i32, %c0_i32_61] : memref<2x8x128xf32, #tpu.memory_space<vmem>> -> memref<1x1x128xf32, #tpu.memory_space<vmem>>
      %123 = tpu.memref_squeeze %122 : memref<1x1x128xf32, #tpu.memory_space<vmem>> -> memref<1x128xf32, #tpu.memory_space<vmem>>
      %124 = tpu.memref_slice %arg11[%12, %c0_i32_59] : memref<2x2x!tpu.dma_semaphore, #tpu.memory_space<semaphore_mem>> -> memref<1x1x!tpu.dma_semaphore, #tpu.memory_space<semaphore_mem>>
      %125 = tpu.memref_squeeze %124 : memref<1x1x!tpu.dma_semaphore, #tpu.memory_space<semaphore_mem>> -> memref<!tpu.dma_semaphore, #tpu.memory_space<semaphore_mem>>
      tpu.enqueue_dma source(%121 : memref<1x128xf32, #tpu.memory_space<any>>) target(%123 : memref<1x128xf32, #tpu.memory_space<vmem>>) target_semaphore(%125 : memref<!tpu.dma_semaphore, #tpu.memory_space<semaphore_mem>>)
      %126 = arith.addi %53, %c4_i32 : i32
      %127 = arith.index_cast %126 : i32 to index
      %128 = memref.load %arg4[%127] : memref<8xi32, #tpu.memory_space<smem>>
      %c1_i32_62 = arith.constant 1 : i32
      %c0_i32_63 = arith.constant 0 : i32
      %129 = tpu.memref_slice %arg5[%128, %c0_i32_63] : memref<10x128xf32, #tpu.memory_space<any>> -> memref<1x128xf32, #tpu.memory_space<any>>
      %c0_i32_64 = arith.constant 0 : i32
      %130 = tpu.memref_slice %arg10[%12, %c4_i32, %c0_i32_64] : memref<2x8x128xf32, #tpu.memory_space<vmem>> -> memref<1x1x128xf32, #tpu.memory_space<vmem>>
      %131 = tpu.memref_squeeze %130 : memref<1x1x128xf32, #tpu.memory_space<vmem>> -> memref<1x128xf32, #tpu.memory_space<vmem>>
      %132 = tpu.memref_slice %arg11[%12, %c1_i32_62] : memref<2x2x!tpu.dma_semaphore, #tpu.memory_space<semaphore_mem>> -> memref<1x1x!tpu.dma_semaphore, #tpu.memory_space<semaphore_mem>>
      %133 = tpu.memref_squeeze %132 : memref<1x1x!tpu.dma_semaphore, #tpu.memory_space<semaphore_mem>> -> memref<!tpu.dma_semaphore, #tpu.memory_space<semaphore_mem>>
      tpu.enqueue_dma source(%129 : memref<1x128xf32, #tpu.memory_space<any>>) target(%131 : memref<1x128xf32, #tpu.memory_space<vmem>>) target_semaphore(%133 : memref<!tpu.dma_semaphore, #tpu.memory_space<semaphore_mem>>)
      %c5_i32 = arith.constant 5 : i32
      %134 = arith.addi %53, %c5_i32 : i32
      %135 = arith.index_cast %134 : i32 to index
      %136 = memref.load %arg2[%135] : memref<8xi32, #tpu.memory_space<smem>>
      %c0_i32_65 = arith.constant 0 : i32
      %c0_i32_66 = arith.constant 0 : i32
      %137 = tpu.memref_slice %arg5[%136, %c0_i32_66] : memref<10x128xf32, #tpu.memory_space<any>> -> memref<1x128xf32, #tpu.memory_space<any>>
      %c0_i32_67 = arith.constant 0 : i32
      %138 = tpu.memref_slice %arg9[%12, %c5_i32, %c0_i32_67] : memref<2x8x128xf32, #tpu.memory_space<vmem>> -> memref<1x1x128xf32, #tpu.memory_space<vmem>>
      %139 = tpu.memref_squeeze %138 : memref<1x1x128xf32, #tpu.memory_space<vmem>> -> memref<1x128xf32, #tpu.memory_space<vmem>>
      %140 = tpu.memref_slice %arg11[%12, %c0_i32_65] : memref<2x2x!tpu.dma_semaphore, #tpu.memory_space<semaphore_mem>> -> memref<1x1x!tpu.dma_semaphore, #tpu.memory_space<semaphore_mem>>
      %141 = tpu.memref_squeeze %140 : memref<1x1x!tpu.dma_semaphore, #tpu.memory_space<semaphore_mem>> -> memref<!tpu.dma_semaphore, #tpu.memory_space<semaphore_mem>>
      tpu.enqueue_dma source(%137 : memref<1x128xf32, #tpu.memory_space<any>>) target(%139 : memref<1x128xf32, #tpu.memory_space<vmem>>) target_semaphore(%141 : memref<!tpu.dma_semaphore, #tpu.memory_space<semaphore_mem>>)
      %142 = arith.addi %53, %c5_i32 : i32
      %143 = arith.index_cast %142 : i32 to index
      %144 = memref.load %arg4[%143] : memref<8xi32, #tpu.memory_space<smem>>
      %c1_i32_68 = arith.constant 1 : i32
      %c0_i32_69 = arith.constant 0 : i32
      %145 = tpu.memref_slice %arg5[%144, %c0_i32_69] : memref<10x128xf32, #tpu.memory_space<any>> -> memref<1x128xf32, #tpu.memory_space<any>>
      %c0_i32_70 = arith.constant 0 : i32
      %146 = tpu.memref_slice %arg10[%12, %c5_i32, %c0_i32_70] : memref<2x8x128xf32, #tpu.memory_space<vmem>> -> memref<1x1x128xf32, #tpu.memory_space<vmem>>
      %147 = tpu.memref_squeeze %146 : memref<1x1x128xf32, #tpu.memory_space<vmem>> -> memref<1x128xf32, #tpu.memory_space<vmem>>
      %148 = tpu.memref_slice %arg11[%12, %c1_i32_68] : memref<2x2x!tpu.dma_semaphore, #tpu.memory_space<semaphore_mem>> -> memref<1x1x!tpu.dma_semaphore, #tpu.memory_space<semaphore_mem>>
      %149 = tpu.memref_squeeze %148 : memref<1x1x!tpu.dma_semaphore, #tpu.memory_space<semaphore_mem>> -> memref<!tpu.dma_semaphore, #tpu.memory_space<semaphore_mem>>
      tpu.enqueue_dma source(%145 : memref<1x128xf32, #tpu.memory_space<any>>) target(%147 : memref<1x128xf32, #tpu.memory_space<vmem>>) target_semaphore(%149 : memref<!tpu.dma_semaphore, #tpu.memory_space<semaphore_mem>>)
      %c6_i32 = arith.constant 6 : i32
      %150 = arith.addi %53, %c6_i32 : i32
      %151 = arith.index_cast %150 : i32 to index
      %152 = memref.load %arg2[%151] : memref<8xi32, #tpu.memory_space<smem>>
      %c0_i32_71 = arith.constant 0 : i32
      %c0_i32_72 = arith.constant 0 : i32
      %153 = tpu.memref_slice %arg5[%152, %c0_i32_72] : memref<10x128xf32, #tpu.memory_space<any>> -> memref<1x128xf32, #tpu.memory_space<any>>
      %c0_i32_73 = arith.constant 0 : i32
      %154 = tpu.memref_slice %arg9[%12, %c6_i32, %c0_i32_73] : memref<2x8x128xf32, #tpu.memory_space<vmem>> -> memref<1x1x128xf32, #tpu.memory_space<vmem>>
      %155 = tpu.memref_squeeze %154 : memref<1x1x128xf32, #tpu.memory_space<vmem>> -> memref<1x128xf32, #tpu.memory_space<vmem>>
      %156 = tpu.memref_slice %arg11[%12, %c0_i32_71] : memref<2x2x!tpu.dma_semaphore, #tpu.memory_space<semaphore_mem>> -> memref<1x1x!tpu.dma_semaphore, #tpu.memory_space<semaphore_mem>>
      %157 = tpu.memref_squeeze %156 : memref<1x1x!tpu.dma_semaphore, #tpu.memory_space<semaphore_mem>> -> memref<!tpu.dma_semaphore, #tpu.memory_space<semaphore_mem>>
      tpu.enqueue_dma source(%153 : memref<1x128xf32, #tpu.memory_space<any>>) target(%155 : memref<1x128xf32, #tpu.memory_space<vmem>>) target_semaphore(%157 : memref<!tpu.dma_semaphore, #tpu.memory_space<semaphore_mem>>)
      %158 = arith.addi %53, %c6_i32 : i32
      %159 = arith.index_cast %158 : i32 to index
      %160 = memref.load %arg4[%159] : memref<8xi32, #tpu.memory_space<smem>>
      %c1_i32_74 = arith.constant 1 : i32
      %c0_i32_75 = arith.constant 0 : i32
      %161 = tpu.memref_slice %arg5[%160, %c0_i32_75] : memref<10x128xf32, #tpu.memory_space<any>> -> memref<1x128xf32, #tpu.memory_space<any>>
      %c0_i32_76 = arith.constant 0 : i32
      %162 = tpu.memref_slice %arg10[%12, %c6_i32, %c0_i32_76] : memref<2x8x128xf32, #tpu.memory_space<vmem>> -> memref<1x1x128xf32, #tpu.memory_space<vmem>>
      %163 = tpu.memref_squeeze %162 : memref<1x1x128xf32, #tpu.memory_space<vmem>> -> memref<1x128xf32, #tpu.memory_space<vmem>>
      %164 = tpu.memref_slice %arg11[%12, %c1_i32_74] : memref<2x2x!tpu.dma_semaphore, #tpu.memory_space<semaphore_mem>> -> memref<1x1x!tpu.dma_semaphore, #tpu.memory_space<semaphore_mem>>
      %165 = tpu.memref_squeeze %164 : memref<1x1x!tpu.dma_semaphore, #tpu.memory_space<semaphore_mem>> -> memref<!tpu.dma_semaphore, #tpu.memory_space<semaphore_mem>>
      tpu.enqueue_dma source(%161 : memref<1x128xf32, #tpu.memory_space<any>>) target(%163 : memref<1x128xf32, #tpu.memory_space<vmem>>) target_semaphore(%165 : memref<!tpu.dma_semaphore, #tpu.memory_space<semaphore_mem>>)
      %c7_i32 = arith.constant 7 : i32
      %166 = arith.addi %53, %c7_i32 : i32
      %167 = arith.index_cast %166 : i32 to index
      %168 = memref.load %arg2[%167] : memref<8xi32, #tpu.memory_space<smem>>
      %c0_i32_77 = arith.constant 0 : i32
      %c0_i32_78 = arith.constant 0 : i32
      %169 = tpu.memref_slice %arg5[%168, %c0_i32_78] : memref<10x128xf32, #tpu.memory_space<any>> -> memref<1x128xf32, #tpu.memory_space<any>>
      %c0_i32_79 = arith.constant 0 : i32
      %170 = tpu.memref_slice %arg9[%12, %c7_i32, %c0_i32_79] : memref<2x8x128xf32, #tpu.memory_space<vmem>> -> memref<1x1x128xf32, #tpu.memory_space<vmem>>
      %171 = tpu.memref_squeeze %170 : memref<1x1x128xf32, #tpu.memory_space<vmem>> -> memref<1x128xf32, #tpu.memory_space<vmem>>
      %172 = tpu.memref_slice %arg11[%12, %c0_i32_77] : memref<2x2x!tpu.dma_semaphore, #tpu.memory_space<semaphore_mem>> -> memref<1x1x!tpu.dma_semaphore, #tpu.memory_space<semaphore_mem>>
      %173 = tpu.memref_squeeze %172 : memref<1x1x!tpu.dma_semaphore, #tpu.memory_space<semaphore_mem>> -> memref<!tpu.dma_semaphore, #tpu.memory_space<semaphore_mem>>
      tpu.enqueue_dma source(%169 : memref<1x128xf32, #tpu.memory_space<any>>) target(%171 : memref<1x128xf32, #tpu.memory_space<vmem>>) target_semaphore(%173 : memref<!tpu.dma_semaphore, #tpu.memory_space<semaphore_mem>>)
      %174 = arith.addi %53, %c7_i32 : i32
      %175 = arith.index_cast %174 : i32 to index
      %176 = memref.load %arg4[%175] : memref<8xi32, #tpu.memory_space<smem>>
      %c1_i32_80 = arith.constant 1 : i32
      %c0_i32_81 = arith.constant 0 : i32
      %177 = tpu.memref_slice %arg5[%176, %c0_i32_81] : memref<10x128xf32, #tpu.memory_space<any>> -> memref<1x128xf32, #tpu.memory_space<any>>
      %c0_i32_82 = arith.constant 0 : i32
      %178 = tpu.memref_slice %arg10[%12, %c7_i32, %c0_i32_82] : memref<2x8x128xf32, #tpu.memory_space<vmem>> -> memref<1x1x128xf32, #tpu.memory_space<vmem>>
      %179 = tpu.memref_squeeze %178 : memref<1x1x128xf32, #tpu.memory_space<vmem>> -> memref<1x128xf32, #tpu.memory_space<vmem>>
      %180 = tpu.memref_slice %arg11[%12, %c1_i32_80] : memref<2x2x!tpu.dma_semaphore, #tpu.memory_space<semaphore_mem>> -> memref<1x1x!tpu.dma_semaphore, #tpu.memory_space<semaphore_mem>>
      %181 = tpu.memref_squeeze %180 : memref<1x1x!tpu.dma_semaphore, #tpu.memory_space<semaphore_mem>> -> memref<!tpu.dma_semaphore, #tpu.memory_space<semaphore_mem>>
      tpu.enqueue_dma source(%177 : memref<1x128xf32, #tpu.memory_space<any>>) target(%179 : memref<1x128xf32, #tpu.memory_space<vmem>>) target_semaphore(%181 : memref<!tpu.dma_semaphore, #tpu.memory_space<semaphore_mem>>)
      %c8_i32_83 = arith.constant 8 : i32
    } else {
    }
    %c0_i32_10 = arith.constant 0 : i32
    %c0_i32_11 = arith.constant 0 : i32
    %c0_i32_12 = arith.constant 0 : i32
    %20 = tpu.memref_slice %arg9[%11, %c0_i32_11, %c0_i32_12] : memref<2x8x128xf32, #tpu.memory_space<vmem>> -> memref<1x8x128xf32, #tpu.memory_space<vmem>>
    %21 = tpu.memref_squeeze %20 : memref<1x8x128xf32, #tpu.memory_space<vmem>> -> memref<8x128xf32, #tpu.memory_space<vmem>>
    %c0_i32_13 = arith.constant 0 : i32
    %c0_i32_14 = arith.constant 0 : i32
    %22 = tpu.memref_slice %arg9[%11, %c0_i32_13, %c0_i32_14] : memref<2x8x128xf32, #tpu.memory_space<vmem>> -> memref<1x8x128xf32, #tpu.memory_space<vmem>>
    %23 = tpu.memref_squeeze %22 : memref<1x8x128xf32, #tpu.memory_space<vmem>> -> memref<8x128xf32, #tpu.memory_space<vmem>>
    %24 = tpu.memref_slice %arg11[%11, %c0_i32_10] : memref<2x2x!tpu.dma_semaphore, #tpu.memory_space<semaphore_mem>> -> memref<1x1x!tpu.dma_semaphore, #tpu.memory_space<semaphore_mem>>
    %25 = tpu.memref_squeeze %24 : memref<1x1x!tpu.dma_semaphore, #tpu.memory_space<semaphore_mem>> -> memref<!tpu.dma_semaphore, #tpu.memory_space<semaphore_mem>>
    tpu.wait_dma2 semaphore(%25 : memref<!tpu.dma_semaphore, #tpu.memory_space<semaphore_mem>>) src(%21 : memref<8x128xf32, #tpu.memory_space<vmem>>) dst(%23 : memref<8x128xf32, #tpu.memory_space<vmem>>)
    %c1_i32_15 = arith.constant 1 : i32
    %c0_i32_16 = arith.constant 0 : i32
    %c0_i32_17 = arith.constant 0 : i32
    %26 = tpu.memref_slice %arg10[%11, %c0_i32_16, %c0_i32_17] : memref<2x8x128xf32, #tpu.memory_space<vmem>> -> memref<1x8x128xf32, #tpu.memory_space<vmem>>
    %27 = tpu.memref_squeeze %26 : memref<1x8x128xf32, #tpu.memory_space<vmem>> -> memref<8x128xf32, #tpu.memory_space<vmem>>
    %c0_i32_18 = arith.constant 0 : i32
    %c0_i32_19 = arith.constant 0 : i32
    %28 = tpu.memref_slice %arg10[%11, %c0_i32_18, %c0_i32_19] : memref<2x8x128xf32, #tpu.memory_space<vmem>> -> memref<1x8x128xf32, #tpu.memory_space<vmem>>
    %29 = tpu.memref_squeeze %28 : memref<1x8x128xf32, #tpu.memory_space<vmem>> -> memref<8x128xf32, #tpu.memory_space<vmem>>
    %30 = tpu.memref_slice %arg11[%11, %c1_i32_15] : memref<2x2x!tpu.dma_semaphore, #tpu.memory_space<semaphore_mem>> -> memref<1x1x!tpu.dma_semaphore, #tpu.memory_space<semaphore_mem>>
    %31 = tpu.memref_squeeze %30 : memref<1x1x!tpu.dma_semaphore, #tpu.memory_space<semaphore_mem>> -> memref<!tpu.dma_semaphore, #tpu.memory_space<semaphore_mem>>
    tpu.wait_dma2 semaphore(%31 : memref<!tpu.dma_semaphore, #tpu.memory_space<semaphore_mem>>) src(%27 : memref<8x128xf32, #tpu.memory_space<vmem>>) dst(%29 : memref<8x128xf32, #tpu.memory_space<vmem>>)
    %32 = arith.index_cast %11 : i32 to index
    %c0 = arith.constant 0 : index
    %c0_20 = arith.constant 0 : index
    %33 = vector.load %arg9[%32, %c0, %c0_20] : memref<2x8x128xf32, #tpu.memory_space<vmem>>, vector<1x8x128xf32>
    %34 = vector.shape_cast %33 : vector<1x8x128xf32> to vector<8x128xf32>
    %35 = arith.index_cast %11 : i32 to index
    %c0_21 = arith.constant 0 : index
    %c0_22 = arith.constant 0 : index
    %36 = vector.load %arg10[%35, %c0_21, %c0_22] : memref<2x8x128xf32, #tpu.memory_space<vmem>>, vector<1x8x128xf32>
    %37 = vector.shape_cast %36 : vector<1x8x128xf32> to vector<8x128xf32>
    %c0_23 = arith.constant 0 : index
    %c0_24 = arith.constant 0 : index
    %38 = vector.load %arg6[%c0_23, %c0_24] : memref<5x128xf32, #tpu.memory_space<vmem>>, vector<5x128xf32>
    %39 = tpu.iota {dimensions = array<i32: 0>} : vector<5x8xi32>
    %c0_25 = arith.constant 0 : index
    %c0_26 = arith.constant 0 : index
    %c0_27 = arith.constant 0 : index
    %40 = vector.load %arg7[%c0_25, %c0_26, %c0_27] : memref<1x1x8xi32, #tpu.memory_space<vmem>>, vector<1x1x8xi32>
    %41 = vector.shape_cast %40 : vector<1x1x8xi32> to vector<1x8xi32>
    %42 = vector.broadcast %41 : vector<1x8xi32> to vector<5x8xi32>
    %43 = arith.cmpi eq, %39, %42 : vector<5x8xi32>
    %44 = arith.extui %43 : vector<5x8xi1> to vector<5x8xi32>
    %45 = arith.sitofp %44 : vector<5x8xi32> to vector<5x8xf32>
    %cst = arith.constant dense<0.000000e+00> : vector<8x128xf32>
    %46 = tpu.matmul %45, %38, %cst {dimension_numbers = #tpu.dot_dimension_numbers<[0], [0], [1], [1], [0, 1, 1, 1], [], []>} : vector<5x8xf32>, vector<5x128xf32>, vector<8x128xf32> -> vector<8x128xf32>
    %47 = arith.mulf %34, %37 : vector<8x128xf32>
    %48 = arith.mulf %47, %46 : vector<8x128xf32>
    %cst_28 = arith.constant dense<0.000000e+00> : vector<8xf32>
    %49 = vector.multi_reduction <add>, %48, %cst_28 [1] : vector<8x128xf32> to vector<8xf32>
    %50 = vector.shape_cast %49 : vector<8xf32> to vector<8x1xf32>
    %c0_29 = arith.constant 0 : index
    %c0_30 = arith.constant 0 : index
    %51 = vector.load %arg8[%c0_29, %c0_30] : memref<8x1xf32, #tpu.memory_space<vmem>>, vector<8x1xf32>
    tpu.vector_store %arg8[%c0_29, %c0_30], %50 {strides = array<i32>} : memref<8x1xf32, #tpu.memory_space<vmem>>, vector<8x1xf32>,
    return
  }
  func.func @transform_1(%arg0: i32, %arg1: i32, %arg2: memref<8xi32, #tpu.memory_space<smem>>, %arg3: memref<8xi32, #tpu.memory_space<smem>>, %arg4: memref<8xi32, #tpu.memory_space<smem>>) -> (i32, i32) {
    %c0_i32 = arith.constant 0 : i32
    %c0_i32_0 = arith.constant 0 : i32
    %c0_i32_1 = arith.constant 0 : i32
    return %c0_i32, %c0_i32_0 : i32, i32
  }
  func.func @transform_2(%arg0: i32, %arg1: i32, %arg2: memref<8xi32, #tpu.memory_space<smem>>, %arg3: memref<8xi32, #tpu.memory_space<smem>>, %arg4: memref<8xi32, #tpu.memory_space<smem>>) -> (i32, i32, i32) {
    %c1_i32 = arith.constant 1 : i32
    %0 = arith.muli %arg0, %c1_i32 : i32
    %1 = arith.addi %0, %arg1 : i32
    %c0_i32 = arith.constant 0 : i32
    %c0_i32_0 = arith.constant 0 : i32
    %c0_i32_1 = arith.constant 0 : i32
    return %1, %c0_i32, %c0_i32_0 : i32, i32, i32
  }
  func.func @transform_3(%arg0: i32, %arg1: i32, %arg2: memref<8xi32, #tpu.memory_space<smem>>, %arg3: memref<8xi32, #tpu.memory_space<smem>>, %arg4: memref<8xi32, #tpu.memory_space<smem>>) -> (i32, i32) {
    %c1_i32 = arith.constant 1 : i32
    %0 = arith.muli %arg0, %c1_i32 : i32
    %1 = arith.addi %0, %arg1 : i32
    %c0_i32 = arith.constant 0 : i32
    %c0_i32_0 = arith.constant 0 : i32
    return %1, %c0_i32 : i32, i32
  }
}

</mosaic_0001>

<bundles_post_ra>
// kernel: tpu_custom_call.1
= control target key start
LH: loop header
LB: loop body
LE: loop exit
PB: predicated region body
PF: predicated region fallthrough
CT: control target
= control target key end

     0   :  { %s1832_s0 = inlined_call_operand.hbm [shape: s32[8], index: 0, kind: input, shape index: {}]   ;;  %s1833_s3 = inlined_call_operand.hbm [shape: f32[10,128], index: 3, kind: input, shape index: {}]   ;;  %s1834_s4 = inlined_call_operand.vmem [shape: f32[5,128], index: 4, kind: input, shape index: {}]   ;;  %s1835_s5 = inlined_call_operand.vmem [shape: s32[1,1,8], index: 5, kind: input, shape index: {}]   ;;  %s1836_s6 = inlined_call_operand.vmem [shape: f32[8,1], index: 6, kind: output, shape index: {}]   ;;  %s1837_s1 = inlined_call_operand.vmem [shape: s32[8], index: 1, kind: input, shape index: {}]   ;;  %s1838_s2 = inlined_call_operand.vmem [shape: s32[8], index: 2, kind: input, shape index: {}]  }
   0x1   :  { %s1059_s23 = scalar_lea.hbm %s1832_s0, 16 }
   0x2   :  { %p1060_p0 = scmp.ne.s32.totalorder %s1832_s0, %s1059_s23  ;;  %p1063_p1 = scmp.lt.u32.totalorder %s1059_s23, %s1832_s0 }
   0x4   :  { %p1065_p2 = pnand %p1063_p1, %p1060_p0 }
   0x6   :  { %1068 = shalt.err (!%p1065_p2)  }
   0x7   :  { %s1483_s28 = smov [#allocation6]   ;;  %s13_s9 = sshll.u32 %s1837_s1, 4  ;;  %s14_s9 = int_to_ptr.vmem [resolvable:$true] %s13_s9 }
   0x8   :  { %12 = dma.hbm_to_smem %s1832_s0, 16, %s1483_s28, [#allocation5] }
   0x9   :  { %s17_s12 = sshll.u32 %s1838_s2, 4  ;;  %s1069_s13 = scalar_lea.vmem %s14_s9, 16  ;;  %s18_s12 = int_to_ptr.vmem [resolvable:$true] %s17_s12 }
   0xa   :  { %p1070_p3 = scmp.ne.s32.totalorder %s14_s9, %s1069_s13  ;;  %p1074_p4 = scmp.lt.s32.totalorder %s14_s9, %s14_s9 }
   0xb   :  { %p1075_p5 = scmp.lt.s32.totalorder %s1069_s13, %s1069_s13 }
   0xd   :  { %p1076_p6 = por %p1075_p5, %p1074_p4 }
   0xf   :  { %p1077_p7 = pnand %p1076_p6, %p1070_p3 }
  0x11   :  { %1080 = shalt.err (!%p1077_p7)  }
  0x12   :  { %s1484_s14 = smov [#allocation7]   ;;  %s1081_s0 = scalar_lea.vmem %s18_s12, 16 }
  0x13   :  { %16 = dma.vmem_to_smem %s14_s9, 16, %s1484_s14, [#allocation5] }
  0x14   :  { %p1082_p8 = scmp.ne.s32.totalorder %s18_s12, %s1081_s0  ;;  %p1086_p9 = scmp.lt.s32.totalorder %s18_s12, %s18_s12 }
  0x15   :  { %p1087_p10 = scmp.lt.s32.totalorder %s1081_s0, %s1081_s0 }
  0x17   :  { %p1088_p11 = por %p1087_p10, %p1086_p9 }
  0x19   :  { %p1089_p12 = pnand %p1088_p11, %p1082_p8 }
  0x1b   :  { %1092 = shalt.err (!%p1089_p12)  }
  0x1c   :  { %s1485_s1 = smov [#allocation8]  }
  0x1d   :  { %20 = dma.vmem_to_smem %s18_s12, 16, %s1485_s1, [#allocation5] }
  0x1e   :  { %1477 = dma.done.wait [#allocation5], 48 }
  0x1f   :  { %1478 = vsyncadd [#allocation5], 4294967248 }
  0x20   :  { %22 = sfence }
  0x21   :  { %s67_s2 = sld [smem:[#allocation6]]  ;;  %s1486_s15 = smov [#allocation2]  }
  0x22   :  { %s81_s16 = sshll.u32 %s1486_s15, 4  ;;  %s1557_s17 = sld [smem:[#allocation8]]  ;;  %s1559_s16 = int_to_ptr.vmem [resolvable:$true] %s81_s16 }
  0x23   :  { %s1487_s18 = smov [#allocation3]   ;;  %s1561_s20 = sld [smem:[#allocation6 + $0x1]] }
  0x24   :  { %s98_s19 = sshll.u32 %s1487_s18, 4  ;;  %s1488_s21 = smov [#allocation2 + $0x1]   ;;  %s1563_s19 = int_to_ptr.vmem [resolvable:$true] %s98_s19 }
  0x25   :  { %s115_s22 = sshll.u32 %s1488_s21, 4  ;;  %s1565_s23 = sld [smem:[#allocation8 + $0x1]]  ;;  %s1567_s22 = int_to_ptr.vmem [resolvable:$true] %s115_s22 }
  0x26   :  { %s1576_s8 = scalar_lea.hbm %s1833_s3, 256 }
  0x27   :  { %s961_s24 = sshll.u32 %s67_s2, 4 }
  0x28   :  { %s69_s27 = scalar_lea.hbm %s1833_s3, %s961_s24  ;;  %s962_s28 = sshll.u32 %s1557_s17, 4 }
  0x29   :  { %s1093_s29 = scalar_lea.hbm %s69_s27, 16  ;;  %p1096_p0 = scmp.lt.u32.totalorder %s69_s27, %s1833_s3 }
  0x2a   :  { %p1094_p13 = scmp.ne.s32.totalorder %s69_s27, %s1093_s29  ;;  %p1097_p1 = scmp.lt.u32.totalorder %s1576_s8, %s1093_s29 }
  0x2b   :  { %p1099_p3 = scmp.lt.u32.totalorder %s1093_s29, %s69_s27 }
  0x2c   :  { %p1098_p2 = por %p1097_p1, %p1096_p0 }
  0x2e   :  { %p1100_p4 = por %p1099_p3, %p1098_p2 }
  0x30   :  { %p1101_p5 = pnand %p1100_p4, %p1094_p13 }
  0x32   :  { %1104 = shalt.err (!%p1101_p5)  }
  0x33   :  { %s1105_s11 = scalar_lea.vmem %s1559_s16, 16  ;;  %s1585_s12 = scalar_lea.vmem %s1559_s16, 256 }
  0x34   :  { %p1106_p6 = scmp.ne.s32.totalorder %s1559_s16, %s1105_s11  ;;  %p1110_p7 = scmp.lt.s32.totalorder %s1559_s16, %s1559_s16 }
  0x35   :  { %p1111_p8 = scmp.lt.s32.totalorder %s1585_s12, %s1105_s11 }
  0x37   :  { %p1112_p9 = por %p1111_p8, %p1110_p7 }
  0x39   :  { %p1113_p10 = pnand %p1112_p9, %p1106_p6 }
  0x3b   :  { %1116 = shalt.err (!%p1113_p10)  }
  0x3c   :  { %84 = dma.hbm_to_vmem [thread:$0]  %s69_s27, 16, %s1559_s16, [#allocation4] }
  0x3d   :  { %s87_s0 = scalar_lea.hbm %s1833_s3, %s962_s28  ;;  %s964_s1 = sshll.u32 %s1561_s20, 4 }
  0x3e   :  { %s1117_s2 = scalar_lea.hbm %s87_s0, 16  ;;  %p1120_p12 = scmp.lt.u32.totalorder %s87_s0, %s1833_s3 }
  0x3f   :  { %p1118_p11 = scmp.ne.s32.totalorder %s87_s0, %s1117_s2  ;;  %p1121_p13 = scmp.lt.u32.totalorder %s1576_s8, %s1117_s2 }
  0x40   :  { %p1123_p1 = scmp.lt.u32.totalorder %s1117_s2, %s87_s0 }
  0x41   :  { %p1122_p0 = por %p1121_p13, %p1120_p12 }
  0x43   :  { %p1124_p2 = por %p1123_p1, %p1122_p0 }
  0x45   :  { %p1125_p3 = pnand %p1124_p2, %p1118_p11 }
  0x47   :  { %1128 = shalt.err (!%p1125_p3)  }
  0x48   :  { %s1129_s18 = scalar_lea.vmem %s1563_s19, 16  ;;  %s1602_s21 = scalar_lea.vmem %s1563_s19, 256 }
  0x49   :  { %p1130_p4 = scmp.ne.s32.totalorder %s1563_s19, %s1129_s18  ;;  %p1134_p5 = scmp.lt.s32.totalorder %s1563_s19, %s1563_s19 }
  0x4a   :  { %p1135_p6 = scmp.lt.s32.totalorder %s1602_s21, %s1129_s18 }
  0x4c   :  { %p1136_p7 = por %p1135_p6, %p1134_p5 }
  0x4e   :  { %p1137_p8 = pnand %p1136_p7, %p1130_p4 }
  0x50   :  { %1140 = shalt.err (!%p1137_p8)  }
  0x51   :  { %101 = dma.hbm_to_vmem [thread:$0]  %s87_s0, 16, %s1563_s19, [#allocation4 + $0x1] }
  0x52   :  { %s105_s25 = scalar_lea.hbm %s1833_s3, %s964_s1  ;;  %s966_s26 = sshll.u32 %s1565_s23, 4 }
  0x53   :  { %s1141_s27 = scalar_lea.hbm %s105_s25, 16  ;;  %p1144_p10 = scmp.lt.u32.totalorder %s105_s25, %s1833_s3 }
  0x54   :  { %p1142_p9 = scmp.ne.s32.totalorder %s105_s25, %s1141_s27  ;;  %p1145_p11 = scmp.lt.u32.totalorder %s1576_s8, %s1141_s27 }
  0x55   :  { %p1147_p13 = scmp.lt.u32.totalorder %s1141_s27, %s105_s25 }
  0x56   :  { %p1146_p12 = por %p1145_p11, %p1144_p10 }
  0x58   :  { %p1148_p0 = por %p1147_p13, %p1146_p12 }
  0x5a   :  { %p1149_p1 = pnand %p1148_p0, %p1142_p9 }
  0x5c   :  { %1152 = shalt.err (!%p1149_p1)  }
  0x5d   :  { %s1153_s30 = scalar_lea.vmem %s1567_s22, 16  ;;  %p1158_p3 = scmp.lt.s32.totalorder %s1567_s22, %s1559_s16 }
  0x5e   :  { %p1154_p2 = scmp.ne.s32.totalorder %s1567_s22, %s1153_s30  ;;  %p1159_p4 = scmp.lt.s32.totalorder %s1585_s12, %s1153_s30 }
  0x60   :  { %p1160_p5 = por %p1159_p4, %p1158_p3 }
  0x62   :  { %p1161_p6 = pnand %p1160_p5, %p1154_p2 }
  0x64   :  { %1164 = shalt.err (!%p1161_p6)  }
  0x65   :  { %118 = dma.hbm_to_vmem [thread:$0]  %s105_s25, 16, %s1567_s22, [#allocation4] }
  0x66   :  { %s121_s9 = scalar_lea.hbm %s1833_s3, %s966_s26  ;;  %s1489_s10 = smov [#allocation3 + $0x1]  }
  0x67   :  { %s130_s11 = sshll.u32 %s1489_s10, 4  ;;  %s1625_s13 = sld [smem:[#allocation6 + $0x2]]  ;;  %s131_s11 = int_to_ptr.vmem [resolvable:$true] %s130_s11 }
  0x68   :  { %s1165_s14 = scalar_lea.hbm %s121_s9, 16  ;;  %p1168_p8 = scmp.lt.u32.totalorder %s121_s9, %s1833_s3 }
  0x69   :  { %p1166_p7 = scmp.ne.s32.totalorder %s121_s9, %s1165_s14  ;;  %p1169_p9 = scmp.lt.u32.totalorder %s1576_s8, %s1165_s14 }
  0x6a   :  { %p1171_p11 = scmp.lt.u32.totalorder %s1165_s14, %s121_s9 }
  0x6b   :  { %p1170_p10 = por %p1169_p9, %p1168_p8 }
  0x6d   :  { %p1172_p12 = por %p1171_p11, %p1170_p10 }
  0x6f   :  { %p1173_p13 = pnand %p1172_p12, %p1166_p7 }
  0x71   :  { %1176 = shalt.err (!%p1173_p13)  }
  0x72   :  { %s1177_s22 = scalar_lea.vmem %s131_s11, 16  ;;  %p1182_p1 = scmp.lt.s32.totalorder %s131_s11, %s1563_s19 }
  0x73   :  { %p1178_p0 = scmp.ne.s32.totalorder %s131_s11, %s1177_s22  ;;  %p1183_p2 = scmp.lt.s32.totalorder %s1602_s21, %s1177_s22 }
  0x75   :  { %p1184_p3 = por %p1183_p2, %p1182_p1 }
  0x77   :  { %p1185_p4 = pnand %p1184_p3, %p1178_p0 }
  0x79   :  { %1188 = shalt.err (!%p1185_p4)  }
  0x7a   :  { %133 = dma.hbm_to_vmem [thread:$0]  %s121_s9, 16, %s131_s11, [#allocation4 + $0x1] }
  0x7b   :  { %s1490_s2 = smov [#allocation2 + $0x2]   ;;  %s1633_s17 = sld [smem:[#allocation8 + $0x2]] }
  0x7c   :  { %s147_s15 = sshll.u32 %s1490_s2, 4  ;;  %s1491_s18 = smov [#allocation3 + $0x2]   ;;  %s148_s15 = int_to_ptr.vmem [resolvable:$true] %s147_s15 }
  0x7d   :  { %s162_s20 = sshll.u32 %s1491_s18, 4  ;;  %s1635_s24 = sld [smem:[#allocation6 + $0x3]]  ;;  %s1638_s20 = int_to_ptr.vmem [resolvable:$true] %s162_s20 }
  0x7e   :  { %s968_s25 = sshll.u32 %s1625_s13, 4 }
  0x7f   :  { %s137_s28 = scalar_lea.hbm %s1833_s3, %s968_s25 }
  0x80   :  { %s1189_s29 = scalar_lea.hbm %s137_s28, 16  ;;  %p1192_p6 = scmp.lt.u32.totalorder %s137_s28, %s1833_s3 }
  0x81   :  { %p1190_p5 = scmp.ne.s32.totalorder %s137_s28, %s1189_s29  ;;  %p1193_p7 = scmp.lt.u32.totalorder %s1576_s8, %s1189_s29 }
  0x82   :  { %p1195_p9 = scmp.lt.u32.totalorder %s1189_s29, %s137_s28 }
  0x83   :  { %p1194_p8 = por %p1193_p7, %p1192_p6 }
  0x85   :  { %p1196_p10 = por %p1195_p9, %p1194_p8 }
  0x87   :  { %p1197_p11 = pnand %p1196_p10, %p1190_p5 }
  0x89   :  { %1200 = shalt.err (!%p1197_p11)  }
  0x8a   :  { %s1201_s7 = scalar_lea.vmem %s148_s15, 16  ;;  %p1206_p13 = scmp.lt.s32.totalorder %s148_s15, %s1559_s16 }
  0x8b   :  { %p1202_p12 = scmp.ne.s32.totalorder %s148_s15, %s1201_s7  ;;  %p1207_p0 = scmp.lt.s32.totalorder %s1585_s12, %s1201_s7 }
  0x8d   :  { %p1208_p1 = por %p1207_p0, %p1206_p13 }
  0x8f   :  { %p1209_p2 = pnand %p1208_p1, %p1202_p12 }
  0x91   :  { %1212 = shalt.err (!%p1209_p2)  }
  0x92   :  { %150 = dma.hbm_to_vmem [thread:$0]  %s137_s28, 16, %s148_s15, [#allocation4] }
  0x93   :  { %s970_s9 = sshll.u32 %s1633_s17, 4  ;;  %s1492_s10 = smov [#allocation2 + $0x3]  }
  0x94   :  { %s179_s11 = sshll.u32 %s1492_s10, 4  ;;  %s153_s0 = scalar_lea.hbm %s1833_s3, %s970_s9  ;;  %s1653_s11 = int_to_ptr.vmem [resolvable:$true] %s179_s11 }
  0x95   :  { %s1213_s1 = scalar_lea.hbm %s153_s0, 16  ;;  %p1216_p4 = scmp.lt.u32.totalorder %s153_s0, %s1833_s3 }
  0x96   :  { %p1214_p3 = scmp.ne.s32.totalorder %s153_s0, %s1213_s1  ;;  %p1217_p5 = scmp.lt.u32.totalorder %s1576_s8, %s1213_s1 }
  0x97   :  { %p1219_p7 = scmp.lt.u32.totalorder %s1213_s1, %s153_s0 }
  0x98   :  { %p1218_p6 = por %p1217_p5, %p1216_p4 }
  0x9a   :  { %p1220_p8 = por %p1219_p7, %p1218_p6 }
  0x9c   :  { %p1221_p9 = pnand %p1220_p8, %p1214_p3 }
  0x9e   :  { %1224 = shalt.err (!%p1221_p9)  }
  0x9f   :  { %s1225_s15 = scalar_lea.vmem %s1638_s20, 16  ;;  %p1230_p11 = scmp.lt.s32.totalorder %s1638_s20, %s1563_s19 }
  0xa0   :  { %p1226_p10 = scmp.ne.s32.totalorder %s1638_s20, %s1225_s15  ;;  %p1231_p12 = scmp.lt.s32.totalorder %s1602_s21, %s1225_s15 }
  0xa2   :  { %p1232_p13 = por %p1231_p12, %p1230_p11 }
  0xa4   :  { %p1233_p0 = pnand %p1232_p13, %p1226_p10 }
  0xa6   :  { %1236 = shalt.err (!%p1233_p0)  }
  0xa7   :  { %165 = dma.hbm_to_vmem [thread:$0]  %s153_s0, 16, %s1638_s20, [#allocation4 + $0x1] }
  0xa8   :  { %s972_s17 = sshll.u32 %s1635_s24, 4  ;;  %s1666_s18 = sld [smem:[#allocation8 + $0x3]] }
  0xa9   :  { %s169_s27 = scalar_lea.hbm %s1833_s3, %s972_s17 }
  0xaa   :  { %s1237_s28 = scalar_lea.hbm %s169_s27, 16  ;;  %p1240_p2 = scmp.lt.u32.totalorder %s169_s27, %s1833_s3 }
  0xab   :  { %p1238_p1 = scmp.ne.s32.totalorder %s169_s27, %s1237_s28  ;;  %p1241_p3 = scmp.lt.u32.totalorder %s1576_s8, %s1237_s28 }
  0xac   :  { %p1243_p5 = scmp.lt.u32.totalorder %s1237_s28, %s169_s27 }
  0xad   :  { %p1242_p4 = por %p1241_p3, %p1240_p2 }
  0xaf   :  { %p1244_p6 = por %p1243_p5, %p1242_p4 }
  0xb1   :  { %p1245_p7 = pnand %p1244_p6, %p1238_p1 }
  0xb3   :  { %1248 = shalt.err (!%p1245_p7)  }
  0xb4   :  { %s1249_s20 = scalar_lea.vmem %s1653_s11, 16  ;;  %p1254_p9 = scmp.lt.s32.totalorder %s1653_s11, %s1559_s16 }
  0xb5   :  { %p1250_p8 = scmp.ne.s32.totalorder %s1653_s11, %s1249_s20  ;;  %p1255_p10 = scmp.lt.s32.totalorder %s1585_s12, %s1249_s20 }
  0xb7   :  { %p1256_p11 = por %p1255_p10, %p1254_p9 }
  0xb9   :  { %p1257_p12 = pnand %p1256_p11, %p1250_p8 }
  0xbb   :  { %1260 = shalt.err (!%p1257_p12)  }
  0xbc   :  { %182 = dma.hbm_to_vmem [thread:$0]  %s169_s27, 16, %s1653_s11, [#allocation4] }
  0xbd   :  { %s1493_s24 = smov [#allocation3 + $0x3]   ;;  %s1681_s7 = sld [smem:[#allocation6 + $0x4]] }
  0xbe   :  { %s194_s23 = sshll.u32 %s1493_s24, 4  ;;  %s1494_s9 = smov [#allocation2 + $0x4]   ;;  %s195_s23 = int_to_ptr.vmem [resolvable:$true] %s194_s23 }
  0xbf   :  { %s211_s10 = sshll.u32 %s1494_s9, 4  ;;  %s1683_s13 = sld [smem:[#allocation8 + $0x4]]  ;;  %s1686_s10 = int_to_ptr.vmem [resolvable:$true] %s211_s10 }
  0xc0   :  { %s974_s14 = sshll.u32 %s1666_s18, 4 }
  0xc1   :  { %s185_s22 = scalar_lea.hbm %s1833_s3, %s974_s14 }
  0xc2   :  { %s1261_s2 = scalar_lea.hbm %s185_s22, 16  ;;  %p1264_p0 = scmp.lt.u32.totalorder %s185_s22, %s1833_s3 }
  0xc3   :  { %p1262_p13 = scmp.ne.s32.totalorder %s185_s22, %s1261_s2  ;;  %p1265_p1 = scmp.lt.u32.totalorder %s1576_s8, %s1261_s2 }
  0xc4   :  { %p1267_p3 = scmp.lt.u32.totalorder %s1261_s2, %s185_s22 }
  0xc5   :  { %p1266_p2 = por %p1265_p1, %p1264_p0 }
  0xc7   :  { %p1268_p4 = por %p1267_p3, %p1266_p2 }
  0xc9   :  { %p1269_p5 = pnand %p1268_p4, %p1262_p13 }
  0xcb   :  { %1272 = shalt.err (!%p1269_p5)  }
  0xcc   :  { %s1273_s17 = scalar_lea.vmem %s195_s23, 16  ;;  %p1278_p7 = scmp.lt.s32.totalorder %s195_s23, %s1563_s19 }
  0xcd   :  { %p1274_p6 = scmp.ne.s32.totalorder %s195_s23, %s1273_s17  ;;  %p1279_p8 = scmp.lt.s32.totalorder %s1602_s21, %s1273_s17 }
  0xcf   :  { %p1280_p9 = por %p1279_p8, %p1278_p7 }
  0xd1   :  { %p1281_p10 = pnand %p1280_p9, %p1274_p6 }
  0xd3   :  { %1284 = shalt.err (!%p1281_p10)  }
  0xd4   :  { %197 = dma.hbm_to_vmem [thread:$0]  %s185_s22, 16, %s195_s23, [#allocation4 + $0x1] }
  0xd5   :  { %s976_s18 = sshll.u32 %s1681_s7, 4  ;;  %s1495_s25 = smov [#allocation3 + $0x4]  }
  0xd6   :  { %s226_s26 = sshll.u32 %s1495_s25, 4  ;;  %s201_s29 = scalar_lea.hbm %s1833_s3, %s976_s18  ;;  %s1701_s26 = int_to_ptr.vmem [resolvable:$true] %s226_s26 }
  0xd7   :  { %s1285_s30 = scalar_lea.hbm %s201_s29, 16  ;;  %p1288_p12 = scmp.lt.u32.totalorder %s201_s29, %s1833_s3 }
  0xd8   :  { %p1286_p11 = scmp.ne.s32.totalorder %s201_s29, %s1285_s30  ;;  %p1289_p13 = scmp.lt.u32.totalorder %s1576_s8, %s1285_s30 }
  0xd9   :  { %p1291_p1 = scmp.lt.u32.totalorder %s1285_s30, %s201_s29 }
  0xda   :  { %p1290_p0 = por %p1289_p13, %p1288_p12 }
  0xdc   :  { %p1292_p2 = por %p1291_p1, %p1290_p0 }
  0xde   :  { %p1293_p3 = pnand %p1292_p2, %p1286_p11 }
  0xe0   :  { %1296 = shalt.err (!%p1293_p3)  }
  0xe1   :  { %s1297_s23 = scalar_lea.vmem %s1686_s10, 16  ;;  %p1302_p5 = scmp.lt.s32.totalorder %s1686_s10, %s1559_s16 }
  0xe2   :  { %p1298_p4 = scmp.ne.s32.totalorder %s1686_s10, %s1297_s23  ;;  %p1303_p6 = scmp.lt.s32.totalorder %s1585_s12, %s1297_s23 }
  0xe4   :  { %p1304_p7 = por %p1303_p6, %p1302_p5 }
  0xe6   :  { %p1305_p8 = pnand %p1304_p7, %p1298_p4 }
  0xe8   :  { %1308 = shalt.err (!%p1305_p8)  }
  0xe9   :  { %214 = dma.hbm_to_vmem [thread:$0]  %s201_s29, 16, %s1686_s10, [#allocation4] }
  0xea   :  { %s978_s7 = sshll.u32 %s1683_s13, 4  ;;  %s1714_s9 = sld [smem:[#allocation6 + $0x5]] }
  0xeb   :  { %s217_s1 = scalar_lea.hbm %s1833_s3, %s978_s7 }
  0xec   :  { %s1309_s22 = scalar_lea.hbm %s217_s1, 16  ;;  %p1312_p10 = scmp.lt.u32.totalorder %s217_s1, %s1833_s3 }
  0xed   :  { %p1310_p9 = scmp.ne.s32.totalorder %s217_s1, %s1309_s22  ;;  %p1313_p11 = scmp.lt.u32.totalorder %s1576_s8, %s1309_s22 }
  0xee   :  { %p1315_p13 = scmp.lt.u32.totalorder %s1309_s22, %s217_s1 }
  0xef   :  { %p1314_p12 = por %p1313_p11, %p1312_p10 }
  0xf1   :  { %p1316_p0 = por %p1315_p13, %p1314_p12 }
  0xf3   :  { %p1317_p1 = pnand %p1316_p0, %p1310_p9 }
  0xf5   :  { %1320 = shalt.err (!%p1317_p1)  }
  0xf6   :  { %s1321_s10 = scalar_lea.vmem %s1701_s26, 16  ;;  %p1326_p3 = scmp.lt.s32.totalorder %s1701_s26, %s1563_s19 }
  0xf7   :  { %p1322_p2 = scmp.ne.s32.totalorder %s1701_s26, %s1321_s10  ;;  %p1327_p4 = scmp.lt.s32.totalorder %s1602_s21, %s1321_s10 }
  0xf9   :  { %p1328_p5 = por %p1327_p4, %p1326_p3 }
  0xfb   :  { %p1329_p6 = pnand %p1328_p5, %p1322_p2 }
  0xfd   :  { %1332 = shalt.err (!%p1329_p6)  }
  0xfe   :  { %229 = dma.hbm_to_vmem [thread:$0]  %s217_s1, 16, %s1701_s26, [#allocation4 + $0x1] }
  0xff   :  { %s1496_s13 = smov [#allocation2 + $0x5]   ;;  %s1729_s17 = sld [smem:[#allocation8 + $0x5]] }
 0x100   :  { %s243_s11 = sshll.u32 %s1496_s13, 4  ;;  %s1497_s18 = smov [#allocation3 + $0x5]   ;;  %s244_s11 = int_to_ptr.vmem [resolvable:$true] %s243_s11 }
 0x101   :  { %s258_s25 = sshll.u32 %s1497_s18, 4  ;;  %s1731_s27 = sld [smem:[#allocation6 + $0x6]]  ;;  %s1734_s25 = int_to_ptr.vmem [resolvable:$true] %s258_s25 }
 0x102   :  { %s980_s28 = sshll.u32 %s1714_s9, 4 }
 0x103   :  { %s233_s20 = scalar_lea.hbm %s1833_s3, %s980_s28 }
 0x104   :  { %s1333_s24 = scalar_lea.hbm %s233_s20, 16  ;;  %p1336_p8 = scmp.lt.u32.totalorder %s233_s20, %s1833_s3 }
 0x105   :  { %p1334_p7 = scmp.ne.s32.totalorder %s233_s20, %s1333_s24  ;;  %p1337_p9 = scmp.lt.u32.totalorder %s1576_s8, %s1333_s24 }
 0x106   :  { %p1339_p11 = scmp.lt.u32.totalorder %s1333_s24, %s233_s20 }
 0x107   :  { %p1338_p10 = por %p1337_p9, %p1336_p8 }
 0x109   :  { %p1340_p12 = por %p1339_p11, %p1338_p10 }
 0x10b   :  { %p1341_p13 = pnand %p1340_p12, %p1334_p7 }
 0x10d   :  { %1344 = shalt.err (!%p1341_p13)  }
 0x10e   :  { %s1345_s7 = scalar_lea.vmem %s244_s11, 16  ;;  %p1350_p1 = scmp.lt.s32.totalorder %s244_s11, %s1559_s16 }
 0x10f   :  { %p1346_p0 = scmp.ne.s32.totalorder %s244_s11, %s1345_s7  ;;  %p1351_p2 = scmp.lt.s32.totalorder %s1585_s12, %s1345_s7 }
 0x111   :  { %p1352_p3 = por %p1351_p2, %p1350_p1 }
 0x113   :  { %p1353_p4 = pnand %p1352_p3, %p1346_p0 }
 0x115   :  { %1356 = shalt.err (!%p1353_p4)  }
 0x116   :  { %246 = dma.hbm_to_vmem [thread:$0]  %s233_s20, 16, %s244_s11, [#allocation4] }
 0x117   :  { %s982_s9 = sshll.u32 %s1729_s17, 4  ;;  %s1498_s14 = smov [#allocation2 + $0x6]  }
 0x118   :  { %s275_s0 = sshll.u32 %s1498_s14, 4  ;;  %s249_s2 = scalar_lea.hbm %s1833_s3, %s982_s9  ;;  %s1749_s0 = int_to_ptr.vmem [resolvable:$true] %s275_s0 }
 0x119   :  { %s1357_s15 = scalar_lea.hbm %s249_s2, 16  ;;  %p1360_p6 = scmp.lt.u32.totalorder %s249_s2, %s1833_s3 }
 0x11a   :  { %p1358_p5 = scmp.ne.s32.totalorder %s249_s2, %s1357_s15  ;;  %p1361_p7 = scmp.lt.u32.totalorder %s1576_s8, %s1357_s15 }
 0x11b   :  { %p1363_p9 = scmp.lt.u32.totalorder %s1357_s15, %s249_s2 }
 0x11c   :  { %p1362_p8 = por %p1361_p7, %p1360_p6 }
 0x11e   :  { %p1364_p10 = por %p1363_p9, %p1362_p8 }
 0x120   :  { %p1365_p11 = pnand %p1364_p10, %p1358_p5 }
 0x122   :  { %1368 = shalt.err (!%p1365_p11)  }
 0x123   :  { %s1369_s11 = scalar_lea.vmem %s1734_s25, 16  ;;  %p1374_p13 = scmp.lt.s32.totalorder %s1734_s25, %s1563_s19 }
 0x124   :  { %p1370_p12 = scmp.ne.s32.totalorder %s1734_s25, %s1369_s11  ;;  %p1375_p0 = scmp.lt.s32.totalorder %s1602_s21, %s1369_s11 }
 0x126   :  { %p1376_p1 = por %p1375_p0, %p1374_p13 }
 0x128   :  { %p1377_p2 = pnand %p1376_p1, %p1370_p12 }
 0x12a   :  { %1380 = shalt.err (!%p1377_p2)  }
 0x12b   :  { %261 = dma.hbm_to_vmem [thread:$0]  %s249_s2, 16, %s1734_s25, [#allocation4 + $0x1] }
 0x12c   :  { %s984_s17 = sshll.u32 %s1731_s27, 4  ;;  %s1762_s18 = sld [smem:[#allocation8 + $0x6]] }
 0x12d   :  { %s265_s30 = scalar_lea.hbm %s1833_s3, %s984_s17 }
 0x12e   :  { %s1381_s20 = scalar_lea.hbm %s265_s30, 16  ;;  %p1384_p4 = scmp.lt.u32.totalorder %s265_s30, %s1833_s3 }
 0x12f   :  { %p1382_p3 = scmp.ne.s32.totalorder %s265_s30, %s1381_s20  ;;  %p1385_p5 = scmp.lt.u32.totalorder %s1576_s8, %s1381_s20 }
 0x130   :  { %p1387_p7 = scmp.lt.u32.totalorder %s1381_s20, %s265_s30 }
 0x131   :  { %p1386_p6 = por %p1385_p5, %p1384_p4 }
 0x133   :  { %p1388_p8 = por %p1387_p7, %p1386_p6 }
 0x135   :  { %p1389_p9 = pnand %p1388_p8, %p1382_p3 }
 0x137   :  { %1392 = shalt.err (!%p1389_p9)  }
 0x138   :  { %s1393_s25 = scalar_lea.vmem %s1749_s0, 16  ;;  %p1398_p11 = scmp.lt.s32.totalorder %s1749_s0, %s1559_s16 }
 0x139   :  { %p1394_p10 = scmp.ne.s32.totalorder %s1749_s0, %s1393_s25  ;;  %p1399_p12 = scmp.lt.s32.totalorder %s1585_s12, %s1393_s25 }
 0x13b   :  { %p1400_p13 = por %p1399_p12, %p1398_p11 }
 0x13d   :  { %p1401_p0 = pnand %p1400_p13, %p1394_p10 }
 0x13f   :  { %1404 = shalt.err (!%p1401_p0)  }
 0x140   :  { %278 = dma.hbm_to_vmem [thread:$0]  %s265_s30, 16, %s1749_s0, [#allocation4] }
 0x141   :  { %s1499_s27 = smov [#allocation3 + $0x6]   ;;  %s1777_s7 = sld [smem:[#allocation6 + $0x7]] }
 0x142   :  { %s290_s26 = sshll.u32 %s1499_s27, 4  ;;  %s1500_s9 = smov [#allocation2 + $0x7]   ;;  %s291_s26 = int_to_ptr.vmem [resolvable:$true] %s290_s26 }
 0x143   :  { %s307_s14 = sshll.u32 %s1500_s9, 4  ;;  %s1779_s1 = sld [smem:[#allocation8 + $0x7]]  ;;  %s1782_s14 = int_to_ptr.vmem [resolvable:$true] %s307_s14 }
 0x144   :  { %s986_s22 = sshll.u32 %s1762_s18, 4 }
 0x145   :  { %s281_s10 = scalar_lea.hbm %s1833_s3, %s986_s22 }
 0x146   :  { %s1405_s13 = scalar_lea.hbm %s281_s10, 16  ;;  %p1408_p2 = scmp.lt.u32.totalorder %s281_s10, %s1833_s3 }
 0x147   :  { %p1406_p1 = scmp.ne.s32.totalorder %s281_s10, %s1405_s13  ;;  %p1409_p3 = scmp.lt.u32.totalorder %s1576_s8, %s1405_s13 }
 0x148   :  { %p1411_p5 = scmp.lt.u32.totalorder %s1405_s13, %s281_s10 }
 0x149   :  { %p1410_p4 = por %p1409_p3, %p1408_p2 }
 0x14b   :  { %p1412_p6 = por %p1411_p5, %p1410_p4 }
 0x14d   :  { %p1413_p7 = pnand %p1412_p6, %p1406_p1 }
 0x14f   :  { %1416 = shalt.err (!%p1413_p7)  }
 0x150   :  { %s1417_s17 = scalar_lea.vmem %s291_s26, 16  ;;  %p1422_p9 = scmp.lt.s32.totalorder %s291_s26, %s1563_s19 }
 0x151   :  { %p1418_p8 = scmp.ne.s32.totalorder %s291_s26, %s1417_s17  ;;  %p1423_p10 = scmp.lt.s32.totalorder %s1602_s21, %s1417_s17 }
 0x153   :  { %p1424_p11 = por %p1423_p10, %p1422_p9 }
 0x155   :  { %p1425_p12 = pnand %p1424_p11, %p1418_p8 }
 0x157   :  { %1428 = shalt.err (!%p1425_p12)  }
 0x158   :  { %293 = dma.hbm_to_vmem [thread:$0]  %s281_s10, 16, %s291_s26, [#allocation4 + $0x1] }
 0x159   :  { %s988_s18 = sshll.u32 %s1777_s7, 4  ;;  %s1501_s28 = smov [#allocation3 + $0x7]  }
 0x15a   :  { %s322_s29 = sshll.u32 %s1501_s28, 4  ;;  %s297_s24 = scalar_lea.hbm %s1833_s3, %s988_s18  ;;  %s1797_s29 = int_to_ptr.vmem [resolvable:$true] %s322_s29 }
 0x15b   :  { %s1429_s23 = scalar_lea.hbm %s297_s24, 16  ;;  %p1432_p0 = scmp.lt.u32.totalorder %s297_s24, %s1833_s3 }
 0x15c   :  { %p1430_p13 = scmp.ne.s32.totalorder %s297_s24, %s1429_s23  ;;  %p1433_p1 = scmp.lt.u32.totalorder %s1576_s8, %s1429_s23 }
 0x15d   :  { %p1435_p3 = scmp.lt.u32.totalorder %s1429_s23, %s297_s24 }
 0x15e   :  { %p1434_p2 = por %p1433_p1, %p1432_p0 }
 0x160   :  { %p1436_p4 = por %p1435_p3, %p1434_p2 }
 0x162   :  { %p1437_p5 = pnand %p1436_p4, %p1430_p13 }
 0x164   :  { %1440 = shalt.err (!%p1437_p5)  }
 0x165   :  { %s1441_s26 = scalar_lea.vmem %s1782_s14, 16  ;;  %p1446_p7 = scmp.lt.s32.totalorder %s1782_s14, %s1559_s16 }
 0x166   :  { %p1442_p6 = scmp.ne.s32.totalorder %s1782_s14, %s1441_s26  ;;  %p1447_p8 = scmp.lt.s32.totalorder %s1585_s12, %s1441_s26 }
 0x168   :  { %p1448_p9 = por %p1447_p8, %p1446_p7 }
 0x16a   :  { %p1449_p10 = pnand %p1448_p9, %p1442_p6 }
 0x16c   :  { %1452 = shalt.err (!%p1449_p10)  }
 0x16d   :  { %310 = dma.hbm_to_vmem [thread:$0]  %s297_s24, 16, %s1782_s14, [#allocation4] }
 0x16e   :  { %s990_s7 = sshll.u32 %s1779_s1, 4 }
 0x16f   :  { %s313_s2 = scalar_lea.hbm %s1833_s3, %s990_s7 }
 0x170   :  { %s1453_s15 = scalar_lea.hbm %s313_s2, 16  ;;  %p1456_p12 = scmp.lt.u32.totalorder %s313_s2, %s1833_s3 }
 0x171   :  { %p1454_p11 = scmp.ne.s32.totalorder %s313_s2, %s1453_s15  ;;  %p1457_p13 = scmp.lt.u32.totalorder %s1576_s8, %s1453_s15 }
 0x172   :  { %p1459_p1 = scmp.lt.u32.totalorder %s1453_s15, %s313_s2 }
 0x173   :  { %p1458_p0 = por %p1457_p13, %p1456_p12 }
 0x175   :  { %p1460_p2 = por %p1459_p1, %p1458_p0 }
 0x177   :  { %p1461_p3 = pnand %p1460_p2, %p1454_p11 }
 0x179   :  { %1464 = shalt.err (!%p1461_p3)  }
 0x17a   :  { %s1465_s16 = scalar_lea.vmem %s1797_s29, 16  ;;  %p1470_p5 = scmp.lt.s32.totalorder %s1797_s29, %s1563_s19 }
 0x17b   :  { %p1466_p4 = scmp.ne.s32.totalorder %s1797_s29, %s1465_s16  ;;  %p1471_p6 = scmp.lt.s32.totalorder %s1602_s21, %s1465_s16 }
 0x17d   :  { %p1472_p7 = por %p1471_p6, %p1470_p5 }
 0x17f   :  { %p1473_p8 = pnand %p1472_p7, %p1466_p4 }
 0x181   :  { %1476 = shalt.err (!%p1473_p8)  }
 0x182   :  { %325 = dma.hbm_to_vmem [thread:$0]  %s313_s2, 16, %s1797_s29, [#allocation4 + $0x1] }
 0x183   :  { %1479 = dma.done.wait [#allocation4], 128 }
 0x184   :  { %1480 = vsyncadd [#allocation4], 4294967168 }
 0x185   :  { %1481 = dma.done.wait [#allocation4 + $0x1], 128 }
 0x186   :  { %1482 = vsyncadd [#allocation4 + $0x1], 4294967168  ;;  %v607_v0 = vlaneseq  ;;  %v1502_v1 = vmov 0.0   ;;  %vm1503_vm0 = vmmov 0   ;;  %v1023_v3 = vld [vmem:[%s1835_s5] ss:$0 sm:$0xff] }
 0x187   :  { %1033 = vmatprep.subr.mxu0 %v1502_v1  ;;  %1035 = vmatprep.mubr.msk.f32.mxu0 %vm1503_vm0, %v1502_v1  ;;  %v606_v5 = vld [vmem:[%s1834_s4] sm:$0x1f]  ;;  %vm653_vm2 = vcmask 1044480   ;;  %vm649_vm3 = vcmask 39936   ;;  %v604_v7 = vld [vmem:[#allocation2] sm:$0xff]  ;;  %v605_v8 = vld [vmem:[#allocation3] sm:$0xff] }
 0x188   :  { %v608_v2 = vshrl.u32 %v607_v0, 7  ;;  %1034 = vmatpush3.msk.msra.mxu0 %vm653_vm2, %v606_v5  ;;  %v727_v9 = vmul.f32 %v605_v8, %v604_v7  ;;  %vm731_vm4 = vcmask 7168  }
 0x18a   :  { %vm614_vm1 = vcmp.eq.s32.totalorder %v608_v2, %v1023_v3 }
 0x18b   :  { %v1024_v4 = vsel %vm614_vm1, 1.0, %v1502_v1 }
 0x18c   :  { %617 = vxpose.xlu0.b32.start.end [1/1] (short) (narrow) %v1024_v4, 8 }
 0x20c   :  { %v633_v6 = vpop.trf.xlu0 }
 0x20d   :  { %1036 = vmatmul.mubr.msk.f32.vlgmr.msra.gmra.mrb[0].mxu0 %vm649_vm3, %v633_v6 }
 0x2e0   :  { %v723_v10 = vpop.f32.mrb[0].mxu0 }
 0x2e1   :  { %v728_v11 = vmul.f32 %v727_v9, %v723_v10  ;;  %v1037_v12 = vpop.f32.mrb[1].mxu0 }
 0x2e3   :  { %729 = vadd.xlane.f32.xlu0 %v728_v11 }
 0x370   :  { %v730_v13 = vpop.xlane.xlu0 %729 }
 0x371   :  { %732 = vst.msk [vmem:[%s1836_s6] sm:$0xff] %vm731_vm4, %v730_v13 }
 0x372   :  { %748 = vsyncmov [#allocation4] }
 0x375   :  { %s749_s4 = vpop.sfrf %748 }
 0x376   :  { %p1027_p9 = scmp.ne.s32.totalorder %s749_s4, 0 }
 0x378   :  { %753 = shalt.err (%p1027_p9)  }
 0x379   :  { %755 = vsyncmov [#allocation4 + $0x1] }
 0x37c   :  { %s756_s14 = vpop.sfrf %755 }
 0x37d   :  { %p1028_p10 = scmp.ne.s32.totalorder %s756_s14, 0 }
 0x37f   :  { %760 = shalt.err (%p1028_p10)  }
 0x380   :  { %762 = vsyncmov [#allocation4 + $0x2] }
 0x383   :  { %s763_s1 = vpop.sfrf %762 }
 0x384   :  { %p1029_p11 = scmp.ne.s32.totalorder %s763_s1, 0 }
 0x386   :  { %767 = shalt.err (%p1029_p11)  }
 0x387   :  { %769 = vsyncmov [#allocation4 + $0x3] }
 0x38a   :  { %s770_s11 = vpop.sfrf %769 }
 0x38b   :  { %p1030_p12 = scmp.ne.s32.totalorder %s770_s11, 0 }
 0x38d   :  { %774 = shalt.err (%p1030_p12)  }

</bundles_post_ra>
